<compile_context>
chip_gen: v7x
topology: tpu7x:2x2x1
jax: 0.10.0
libtpu: 0.0.40
codegen_flags: <defaults>
</compile_context>

<pallas_src>
import functools

import jax
import jax.numpy as jnp
from jax.experimental import pallas as pl
from jax.experimental.pallas import tpu as pltpu


def _triple_score_kernel(encT_ref, enc_hd_ref, w1h_ref, w1tT_ref, b1_ref,
                         w2_ref, b2_ref, out_ref, tail_ref, *, TH):
    """One grid step = (batch b, head-block j): scores for TH head tokens
    against all L tail tokens, written transposed as [T*R, TH, L].

    encT_ref   : [1, D, L]    encoded text for batch b, channel-major
    enc_hd_ref : [1, TH, D]   the TH head tokens of this block (row-major)
    w1h_ref    : [D, 3D]      head half of the projection weight
    w1tT_ref   : [3D, D]      tail half of the projection weight, transposed
    b1_ref     : [3D, 1]      projection bias (column, f32)
    w2_ref     : [TR, 3D]     relation weight, transposed, tag-major rows
    b2_ref     : [TR, 1]      relation bias (column, tag-major, f32)
    out_ref    : [1, TR, TH, L]  -> out[b, :, j*TH:(j+1)*TH, :]
    tail_ref   : [3D, L]      VMEM scratch: tail projection (+ b1), per batch
    """
    j = pl.program_id(1)

    # Per-batch init: tail projection hoisted out of the head loop.  Persists
    # in VMEM scratch across all head blocks of this batch (j is "arbitrary").
    @pl.when(j == 0)
    def _():
        tail_ref[...] = (
            jnp.dot(w1tT_ref[...], encT_ref[0],
                    preferred_element_type=jnp.float32) + b1_ref[...])

    # Head projection for the whole block of TH heads: [TH, D] @ [D, 3D].
    hh = jnp.dot(enc_hd_ref[0], w1h_ref[...],
                 preferred_element_type=jnp.float32)          # [TH, 3D] f32
    hh_T = jnp.transpose(hh)                                  # [3D, TH] (XLU)

    tail = tail_ref[...]                                      # [3D, L] f32
    w2 = w2_ref[...]                                          # [TR, 3D]
    b2 = b2_ref[...]                                          # [TR, 1]  f32

    # Static unroll over the TH heads of this block.
    for h in range(TH):
        hidden = jnp.maximum(hh_T[:, h:h + 1] + tail, 0.0)    # [3D, L] (ReLU)
        sc = jnp.dot(w2, hidden.astype(w2.dtype),
                     preferred_element_type=jnp.float32) + b2  # [TR, L]
        # Lane-dense (full L) store; sublane index h within the block.
        out_ref[0, :, h, :] = sc.astype(out_ref.dtype)


def triple_score_matrix_pallas(encoded_text, proj_w, proj_b, rel_w, rel_b,
                               rel_num, tag_size):
    """encoded_text: [B, L, D]; proj_w: [2D, 3D]; rel_w: [3D, R*T].

    Returns scores in the *train* layout already: [B, T*R, L, L] (tag-major
    over the second axis), so `reshape(B, T, R, L, L)` is free.
    """
    B, L, D = encoded_text.shape
    D3 = 3 * D
    R, T = rel_num, tag_size
    TR = R * T

    # Head-block size (multiple of 8 to keep blocks (8,128)-legal).
    if L % 16 == 0:
        TH = 16
    elif L % 8 == 0:
        TH = 8
    else:
        TH = L
    NJ = L // TH

    # bf16 matmul operands only on a real TPU (MXU-native, halves input HBM
    # traffic); f32 elsewhere so the interpret/CPU dot path accepts the dots.
    on_tpu = jax.default_backend() == "tpu"
    compute_dtype = jnp.bfloat16 if on_tpu else jnp.float32

    # ---- weight prep (tiny, done once in XLA) ------------------------------
    # concat([head, tail]) @ W1 == head @ W1_head + tail @ W1_tail
    w1_head = proj_w[:D, :]                                  # [D, 3D]
    w1_tail_T = jnp.transpose(proj_w[D:, :])                 # [3D, D]
    b1_col = proj_b.reshape(D3, 1).astype(jnp.float32)
    # Reorder relation weight columns to tag-major (t*R + r) so the kernel's
    # [B, T*R, L, L] output reshapes directly to torch's permute(0,4,3,1,2).
    w2_tm = rel_w.reshape(D3, R, T).transpose(0, 2, 1).reshape(D3, T * R)
    w2_T = jnp.transpose(w2_tm)                              # [TR, 3D]
    b2_col = rel_b.reshape(R, T).T.reshape(T * R, 1).astype(jnp.float32)

    enc_c = encoded_text.astype(compute_dtype)               # [B, L, D]
    enc_T = jnp.transpose(enc_c, (0, 2, 1))                  # [B, D, L]
    w1h_c = w1_head.astype(compute_dtype)
    w1tT_c = w1_tail_T.astype(compute_dtype)
    w2T_c = w2_T.astype(compute_dtype)

    in_bytes = jnp.dtype(compute_dtype).itemsize
    flops = int(B * (2 * D3 * D * L          # tail projection (once / batch)
                     + 2 * D3 * D * L        # head projection (all blocks)
                     + 2 * TR * D3 * L * L)  # score matmul (per head)
                )
    bytes_accessed = int(B * TR * L * L * 4               # f32 scores writeback
                         + 2 * B * D * L * in_bytes       # enc read (2 views)
                         + (D * D3 + D3 * D + TR * D3) * in_bytes
                         + (D3 + TR) * 4)

    out = pl.pallas_call(
        functools.partial(_triple_score_kernel, TH=TH),
        out_shape=jax.ShapeDtypeStruct((B, TR, L, L), jnp.float32),
        grid_spec=pltpu.PrefetchScalarGridSpec(
            num_scalar_prefetch=0,
            grid=(B, NJ),
            in_specs=[
                pl.BlockSpec((1, D, L), lambda b, j: (b, 0, 0)),   # enc_T (tails)
                pl.BlockSpec((1, TH, D), lambda b, j: (b, j, 0)),  # head block
                pl.BlockSpec((D, D3), lambda b, j: (0, 0)),        # W1_head
                pl.BlockSpec((D3, D), lambda b, j: (0, 0)),        # W1_tail^T
                pl.BlockSpec((D3, 1), lambda b, j: (0, 0)),        # b1
                pl.BlockSpec((TR, D3), lambda b, j: (0, 0)),       # W2^T (tag-major)
                pl.BlockSpec((TR, 1), lambda b, j: (0, 0)),        # b2
            ],
            out_specs=pl.BlockSpec((1, TR, TH, L), lambda b, j: (b, 0, j, 0)),
            scratch_shapes=[pltpu.VMEM((D3, L), jnp.float32)],
        ),
        compiler_params=pltpu.CompilerParams(
            # batch axis parallel (megacore); head-block axis MUST be
            # arbitrary so the tail-projection scratch persists across j.
            dimension_semantics=("parallel", "arbitrary"),
            vmem_limit_bytes=48 * 1024 * 1024,
        ),
        cost_estimate=pl.CostEstimate(flops=flops, transcendentals=0,
                                      bytes_accessed=bytes_accessed),
    )(enc_T, enc_c, w1h_c, w1tT_c, b1_col, w2T_c, b2_col)
    return out  # [B, T*R, L, L], tag-major along axis 1


class RelModelPallas:
    """JAX/Pallas re-implementation of RelModel.forward."""

    def __init__(self, bert_dim, rel_num, tag_size, vocab_size=100, seed=0):
        self.bert_dim = bert_dim
        self.rel_num = rel_num
        self.tag_size = tag_size
        key = jax.random.PRNGKey(seed)
        k_emb, k_w1, k_b1, k_w2, k_b2 = jax.random.split(key, 5)
        # TODO(synk): stand-in deterministic encoder (embedding lookup) instead
        # of the pretrained BERT encoder, which has no in-script Pallas equivalent.
        self.embedding = jax.random.normal(k_emb, (vocab_size, bert_dim),
                                           jnp.float32) * 0.02
        d2, d3 = 2 * bert_dim, 3 * bert_dim
        rt = rel_num * tag_size
        self.proj_w = jax.random.normal(k_w1, (d2, d3), jnp.float32) / jnp.sqrt(d2)
        self.proj_b = jax.random.normal(k_b1, (d3,), jnp.float32) * 0.01
        self.rel_w = jax.random.normal(k_w2, (d3, rt), jnp.float32) / jnp.sqrt(d3)
        self.rel_b = jax.random.normal(k_b2, (rt,), jnp.float32) * 0.01

    def get_encoded_text(self, input_ids, attention_mask):
        # Glue: embedding lookup + zero-out padded positions.
        enc = jnp.take(self.embedding, input_ids, axis=0)          # [B, L, D]
        return enc * attention_mask[..., None].astype(jnp.float32)

    def forward(self, input_ids, attention_mask, triple_matrix=None,
                loss_mask=None, train=True):
        B, L = input_ids.shape
        R, T = self.rel_num, self.tag_size

        encoded_text = self.get_encoded_text(input_ids, attention_mask)
        # TODO(synk): self.dropout / self.dropout_2 are identity (eval mode).

        scores_tr = triple_score_matrix_pallas(
            encoded_text, self.proj_w, self.proj_b, self.rel_w, self.rel_b, R, T)
        # Kernel already emits tag-major [B, T*R, L, L] -> train layout is a
        # free reshape (matches torch .permute(0, 4, 3, 1, 2)).
        output = scores_tr.reshape(B, T, R, L, L)

        if train:
            # CrossEntropyLoss(reduction='none') over class dim 1 (= tag),
            # then masked mean (small reduction kept as glue).
            logp = jax.nn.log_softmax(output, axis=1)               # [B,T,R,L,L]
            picked = jnp.take_along_axis(
                logp, triple_matrix[:, None, :, :, :], axis=1)[:, 0]  # [B,R,L,L]
            loss = jnp.sum(-picked * loss_mask) / jnp.sum(loss_mask)
            return output, loss
        else:
            # matches torch .argmax(-1).permute(0, 3, 1, 2) -> [B, R, L, L]
            return jnp.argmax(output, axis=1)


if __name__ == "__main__":
    B, L, D = 2, 8, 32          # batch, seq_len, bert_dim
    REL_NUM, TAG_SIZE = 4, 4
    VOCAB = 100

    key = jax.random.PRNGKey(0)
    k_ids, k_tgt, k_mask = jax.random.split(key, 3)

    input_ids = jax.random.randint(k_ids, (B, L), 0, VOCAB, dtype=jnp.int32)
    attention_mask = jnp.ones((B, L), dtype=jnp.int32)
    triple_matrix = jax.random.randint(k_tgt, (B, REL_NUM, L, L), 0, TAG_SIZE,
                                       dtype=jnp.int32)
    loss_mask = jnp.ones((B, REL_NUM, L, L), dtype=jnp.float32)

    model = RelModelPallas(bert_dim=D, rel_num=REL_NUM, tag_size=TAG_SIZE,
                           vocab_size=VOCAB, seed=0)

    output, loss = model.forward(input_ids, attention_mask,
                                 triple_matrix=triple_matrix,
                                 loss_mask=loss_mask, train=True)
    jax.block_until_ready((output, loss))

    assert output.shape == (B, TAG_SIZE, REL_NUM, L, L), output.shape
    assert loss.shape == (), loss.shape
    assert bool(jnp.isfinite(loss)), "loss is not finite"

    # also exercise the eval path
    pred = model.forward(input_ids, attention_mask, train=False)
    jax.block_until_ready(pred)
    assert pred.shape == (B, REL_NUM, L, L), pred.shape

    print("KERNEL_OK")
</pallas_src>

<mosaic_0001>
module attributes {stable_mosaic.version = 11 : i64} {
  func.func @_triple_score_kernel(%arg0: i32, %arg1: i32, %arg2: memref<1x32x8xf32, #tpu.memory_space<vmem>>, %arg3: memref<1x8x32xf32, #tpu.memory_space<vmem>>, %arg4: memref<32x96xf32, #tpu.memory_space<vmem>>, %arg5: memref<96x32xf32, #tpu.memory_space<vmem>>, %arg6: memref<96x1xf32, #tpu.memory_space<vmem>>, %arg7: memref<16x96xf32, #tpu.memory_space<vmem>>, %arg8: memref<16x1xf32, #tpu.memory_space<vmem>>, %arg9: memref<1x16x8x8xf32, #tpu.memory_space<vmem>>, %arg10: memref<96x8xf32, #tpu.memory_space<vmem>>) attributes {dimension_semantics = [#tpu.dimension_semantics<parallel>, #tpu.dimension_semantics<arbitrary>], iteration_bounds = array<i64: 2, 1>, scalar_prefetch = 0 : i64, scratch_operands = 1 : i64, tpu.core_type = #tpu.core_type<tc>, window_params = [{transform_indices = @transform_0, window_bounds = array<i64: 1, 32, 8>}, {transform_indices = @transform_1, window_bounds = array<i64: 1, 8, 32>}, {pipeline_mode = #tpu.pipeline_mode<synchronous>, transform_indices = @transform_2, window_bounds = array<i64: 32, 96>}, {pipeline_mode = #tpu.pipeline_mode<synchronous>, transform_indices = @transform_3, window_bounds = array<i64: 96, 32>}, {pipeline_mode = #tpu.pipeline_mode<synchronous>, transform_indices = @transform_4, window_bounds = array<i64: 96, 1>}, {pipeline_mode = #tpu.pipeline_mode<synchronous>, transform_indices = @transform_5, window_bounds = array<i64: 16, 96>}, {pipeline_mode = #tpu.pipeline_mode<synchronous>, transform_indices = @transform_6, window_bounds = array<i64: 16, 1>}, {transform_indices = @transform_7, window_bounds = array<i64: 1, 16, 8, 8>}]} {
    %c0_i32 = arith.constant 0 : i32
    %0 = arith.cmpi eq, %arg1, %c0_i32 : i32
    %1 = arith.extui %0 : i1 to i32
    %c0_i32_0 = arith.constant 0 : i32
    %2 = arith.cmpi ne, %1, %c0_i32_0 : i32
    scf.if %2 {
      %c0_52 = arith.constant 0 : index
      %c0_53 = arith.constant 0 : index
      %99 = vector.load %arg5[%c0_52, %c0_53] : memref<96x32xf32, #tpu.memory_space<vmem>>, vector<96x32xf32>
      %c0_54 = arith.constant 0 : index
      %c0_55 = arith.constant 0 : index
      %c0_56 = arith.constant 0 : index
      %100 = vector.load %arg2[%c0_54, %c0_55, %c0_56] : memref<1x32x8xf32, #tpu.memory_space<vmem>>, vector<1x32x8xf32>
      %101 = vector.shape_cast %100 : vector<1x32x8xf32> to vector<32x8xf32>
      %cst_57 = arith.constant dense<0.000000e+00> : vector<96x8xf32>
      %102 = tpu.matmul %99, %101, %cst_57 {dimension_numbers = #tpu.dot_dimension_numbers<[1], [0], [0], [1], [0, 0, 1, 1], [], []>} : vector<96x32xf32>, vector<32x8xf32>, vector<96x8xf32> -> vector<96x8xf32>
      %c0_58 = arith.constant 0 : index
      %c0_59 = arith.constant 0 : index
      %103 = vector.load %arg6[%c0_58, %c0_59] : memref<96x1xf32, #tpu.memory_space<vmem>>, vector<96x1xf32>
      %104 = vector.broadcast %103 : vector<96x1xf32> to vector<96x8xf32>
      %105 = arith.addf %102, %104 : vector<96x8xf32>
      %c0_60 = arith.constant 0 : index
      %c0_61 = arith.constant 0 : index
      %106 = vector.load %arg10[%c0_60, %c0_61] : memref<96x8xf32, #tpu.memory_space<vmem>>, vector<96x8xf32>
      tpu.vector_store %arg10[%c0_60, %c0_61], %105 {strides = array<i32>} : memref<96x8xf32, #tpu.memory_space<vmem>>, vector<96x8xf32>,
    } else {
    }
    %c0 = arith.constant 0 : index
    %c0_1 = arith.constant 0 : index
    %c0_2 = arith.constant 0 : index
    %3 = vector.load %arg3[%c0, %c0_1, %c0_2] : memref<1x8x32xf32, #tpu.memory_space<vmem>>, vector<1x8x32xf32>
    %4 = vector.shape_cast %3 : vector<1x8x32xf32> to vector<8x32xf32>
    %c0_3 = arith.constant 0 : index
    %c0_4 = arith.constant 0 : index
    %5 = vector.load %arg4[%c0_3, %c0_4] : memref<32x96xf32, #tpu.memory_space<vmem>>, vector<32x96xf32>
    %cst = arith.constant dense<0.000000e+00> : vector<8x96xf32>
    %6 = tpu.matmul %4, %5, %cst {dimension_numbers = #tpu.dot_dimension_numbers<[1], [0], [0], [1], [0, 0, 1, 1], [], []>} : vector<8x32xf32>, vector<32x96xf32>, vector<8x96xf32> -> vector<8x96xf32>
    %7 = tpu.transpose %6, [1, 0] : vector<8x96xf32> -> vector<96x8xf32>
    %c0_5 = arith.constant 0 : index
    %c0_6 = arith.constant 0 : index
    %8 = vector.load %arg10[%c0_5, %c0_6] : memref<96x8xf32, #tpu.memory_space<vmem>>, vector<96x8xf32>
    %c0_7 = arith.constant 0 : index
    %c0_8 = arith.constant 0 : index
    %9 = vector.load %arg7[%c0_7, %c0_8] : memref<16x96xf32, #tpu.memory_space<vmem>>, vector<16x96xf32>
    %c0_9 = arith.constant 0 : index
    %c0_10 = arith.constant 0 : index
    %10 = vector.load %arg8[%c0_9, %c0_10] : memref<16x1xf32, #tpu.memory_space<vmem>>, vector<16x1xf32>
    %11 = vector.extract_strided_slice %7 {offsets = [0, 0], sizes = [96, 1], strides = [1, 1]} : vector<96x8xf32> to vector<96x1xf32>
    %12 = vector.broadcast %11 : vector<96x1xf32> to vector<96x8xf32>
    %13 = arith.addf %12, %8 : vector<96x8xf32>
    %cst_11 = arith.constant 0.000000e+00 : f32
    %14 = vector.broadcast %cst_11 : f32 to vector<96x8xf32>
    %15 = arith.maximumf %13, %14 : vector<96x8xf32>
    %cst_12 = arith.constant dense<0.000000e+00> : vector<16x8xf32>
    %16 = tpu.matmul %9, %15, %cst_12 {dimension_numbers = #tpu.dot_dimension_numbers<[1], [0], [0], [1], [0, 0, 1, 1], [], []>} : vector<16x96xf32>, vector<96x8xf32>, vector<16x8xf32> -> vector<16x8xf32>
    %17 = vector.broadcast %10 : vector<16x1xf32> to vector<16x8xf32>
    %18 = arith.addf %16, %17 : vector<16x8xf32>
    %c0_13 = arith.constant 0 : index
    %c0_14 = arith.constant 0 : index
    %c0_15 = arith.constant 0 : index
    %c0_16 = arith.constant 0 : index
    %19 = vector.load %arg9[%c0_13, %c0_14, %c0_15, %c0_16] : memref<1x16x8x8xf32, #tpu.memory_space<vmem>>, vector<1x16x1x8xf32>
    %20 = vector.shape_cast %19 : vector<1x16x1x8xf32> to vector<16x8xf32>
    %21 = vector.shape_cast %18 : vector<16x8xf32> to vector<1x16x1x8xf32>
    tpu.vector_store %arg9[%c0_13, %c0_14, %c0_15, %c0_16], %21 {strides = array<i32>} : memref<1x16x8x8xf32, #tpu.memory_space<vmem>>, vector<1x16x1x8xf32>,
    %22 = vector.extract_strided_slice %7 {offsets = [0, 1], sizes = [96, 1], strides = [1, 1]} : vector<96x8xf32> to vector<96x1xf32>
    %23 = vector.broadcast %22 : vector<96x1xf32> to vector<96x8xf32>
    %24 = arith.addf %23, %8 : vector<96x8xf32>
    %cst_17 = arith.constant 0.000000e+00 : f32
    %25 = vector.broadcast %cst_17 : f32 to vector<96x8xf32>
    %26 = arith.maximumf %24, %25 : vector<96x8xf32>
    %cst_18 = arith.constant dense<0.000000e+00> : vector<16x8xf32>
    %27 = tpu.matmul %9, %26, %cst_18 {dimension_numbers = #tpu.dot_dimension_numbers<[1], [0], [0], [1], [0, 0, 1, 1], [], []>} : vector<16x96xf32>, vector<96x8xf32>, vector<16x8xf32> -> vector<16x8xf32>
    %28 = vector.broadcast %10 : vector<16x1xf32> to vector<16x8xf32>
    %29 = arith.addf %27, %28 : vector<16x8xf32>
    %c0_19 = arith.constant 0 : index
    %c0_20 = arith.constant 0 : index
    %c1 = arith.constant 1 : index
    %c0_21 = arith.constant 0 : index
    %30 = vector.load %arg9[%c0_19, %c0_20, %c1, %c0_21] : memref<1x16x8x8xf32, #tpu.memory_space<vmem>>, vector<1x16x1x8xf32>
    %31 = vector.shape_cast %30 : vector<1x16x1x8xf32> to vector<16x8xf32>
    %32 = vector.shape_cast %29 : vector<16x8xf32> to vector<1x16x1x8xf32>
    tpu.vector_store %arg9[%c0_19, %c0_20, %c1, %c0_21], %32 {strides = array<i32>} : memref<1x16x8x8xf32, #tpu.memory_space<vmem>>, vector<1x16x1x8xf32>,
    %33 = vector.extract_strided_slice %7 {offsets = [0, 2], sizes = [96, 1], strides = [1, 1]} : vector<96x8xf32> to vector<96x1xf32>
    %34 = vector.broadcast %33 : vector<96x1xf32> to vector<96x8xf32>
    %35 = arith.addf %34, %8 : vector<96x8xf32>
    %cst_22 = arith.constant 0.000000e+00 : f32
    %36 = vector.broadcast %cst_22 : f32 to vector<96x8xf32>
    %37 = arith.maximumf %35, %36 : vector<96x8xf32>
    %cst_23 = arith.constant dense<0.000000e+00> : vector<16x8xf32>
    %38 = tpu.matmul %9, %37, %cst_23 {dimension_numbers = #tpu.dot_dimension_numbers<[1], [0], [0], [1], [0, 0, 1, 1], [], []>} : vector<16x96xf32>, vector<96x8xf32>, vector<16x8xf32> -> vector<16x8xf32>
    %39 = vector.broadcast %10 : vector<16x1xf32> to vector<16x8xf32>
    %40 = arith.addf %38, %39 : vector<16x8xf32>
    %c0_24 = arith.constant 0 : index
    %c0_25 = arith.constant 0 : index
    %c2 = arith.constant 2 : index
    %c0_26 = arith.constant 0 : index
    %41 = vector.load %arg9[%c0_24, %c0_25, %c2, %c0_26] : memref<1x16x8x8xf32, #tpu.memory_space<vmem>>, vector<1x16x1x8xf32>
    %42 = vector.shape_cast %41 : vector<1x16x1x8xf32> to vector<16x8xf32>
    %43 = vector.shape_cast %40 : vector<16x8xf32> to vector<1x16x1x8xf32>
    tpu.vector_store %arg9[%c0_24, %c0_25, %c2, %c0_26], %43 {strides = array<i32>} : memref<1x16x8x8xf32, #tpu.memory_space<vmem>>, vector<1x16x1x8xf32>,
    %44 = vector.extract_strided_slice %7 {offsets = [0, 3], sizes = [96, 1], strides = [1, 1]} : vector<96x8xf32> to vector<96x1xf32>
    %45 = vector.broadcast %44 : vector<96x1xf32> to vector<96x8xf32>
    %46 = arith.addf %45, %8 : vector<96x8xf32>
    %cst_27 = arith.constant 0.000000e+00 : f32
    %47 = vector.broadcast %cst_27 : f32 to vector<96x8xf32>
    %48 = arith.maximumf %46, %47 : vector<96x8xf32>
    %cst_28 = arith.constant dense<0.000000e+00> : vector<16x8xf32>
    %49 = tpu.matmul %9, %48, %cst_28 {dimension_numbers = #tpu.dot_dimension_numbers<[1], [0], [0], [1], [0, 0, 1, 1], [], []>} : vector<16x96xf32>, vector<96x8xf32>, vector<16x8xf32> -> vector<16x8xf32>
    %50 = vector.broadcast %10 : vector<16x1xf32> to vector<16x8xf32>
    %51 = arith.addf %49, %50 : vector<16x8xf32>
    %c0_29 = arith.constant 0 : index
    %c0_30 = arith.constant 0 : index
    %c3 = arith.constant 3 : index
    %c0_31 = arith.constant 0 : index
    %52 = vector.load %arg9[%c0_29, %c0_30, %c3, %c0_31] : memref<1x16x8x8xf32, #tpu.memory_space<vmem>>, vector<1x16x1x8xf32>
    %53 = vector.shape_cast %52 : vector<1x16x1x8xf32> to vector<16x8xf32>
    %54 = vector.shape_cast %51 : vector<16x8xf32> to vector<1x16x1x8xf32>
    tpu.vector_store %arg9[%c0_29, %c0_30, %c3, %c0_31], %54 {strides = array<i32>} : memref<1x16x8x8xf32, #tpu.memory_space<vmem>>, vector<1x16x1x8xf32>,
    %55 = vector.extract_strided_slice %7 {offsets = [0, 4], sizes = [96, 1], strides = [1, 1]} : vector<96x8xf32> to vector<96x1xf32>
    %56 = vector.broadcast %55 : vector<96x1xf32> to vector<96x8xf32>
    %57 = arith.addf %56, %8 : vector<96x8xf32>
    %cst_32 = arith.constant 0.000000e+00 : f32
    %58 = vector.broadcast %cst_32 : f32 to vector<96x8xf32>
    %59 = arith.maximumf %57, %58 : vector<96x8xf32>
    %cst_33 = arith.constant dense<0.000000e+00> : vector<16x8xf32>
    %60 = tpu.matmul %9, %59, %cst_33 {dimension_numbers = #tpu.dot_dimension_numbers<[1], [0], [0], [1], [0, 0, 1, 1], [], []>} : vector<16x96xf32>, vector<96x8xf32>, vector<16x8xf32> -> vector<16x8xf32>
    %61 = vector.broadcast %10 : vector<16x1xf32> to vector<16x8xf32>
    %62 = arith.addf %60, %61 : vector<16x8xf32>
    %c0_34 = arith.constant 0 : index
    %c0_35 = arith.constant 0 : index
    %c4 = arith.constant 4 : index
    %c0_36 = arith.constant 0 : index
    %63 = vector.load %arg9[%c0_34, %c0_35, %c4, %c0_36] : memref<1x16x8x8xf32, #tpu.memory_space<vmem>>, vector<1x16x1x8xf32>
    %64 = vector.shape_cast %63 : vector<1x16x1x8xf32> to vector<16x8xf32>
    %65 = vector.shape_cast %62 : vector<16x8xf32> to vector<1x16x1x8xf32>
    tpu.vector_store %arg9[%c0_34, %c0_35, %c4, %c0_36], %65 {strides = array<i32>} : memref<1x16x8x8xf32, #tpu.memory_space<vmem>>, vector<1x16x1x8xf32>,
    %66 = vector.extract_strided_slice %7 {offsets = [0, 5], sizes = [96, 1], strides = [1, 1]} : vector<96x8xf32> to vector<96x1xf32>
    %67 = vector.broadcast %66 : vector<96x1xf32> to vector<96x8xf32>
    %68 = arith.addf %67, %8 : vector<96x8xf32>
    %cst_37 = arith.constant 0.000000e+00 : f32
    %69 = vector.broadcast %cst_37 : f32 to vector<96x8xf32>
    %70 = arith.maximumf %68, %69 : vector<96x8xf32>
    %cst_38 = arith.constant dense<0.000000e+00> : vector<16x8xf32>
    %71 = tpu.matmul %9, %70, %cst_38 {dimension_numbers = #tpu.dot_dimension_numbers<[1], [0], [0], [1], [0, 0, 1, 1], [], []>} : vector<16x96xf32>, vector<96x8xf32>, vector<16x8xf32> -> vector<16x8xf32>
    %72 = vector.broadcast %10 : vector<16x1xf32> to vector<16x8xf32>
    %73 = arith.addf %71, %72 : vector<16x8xf32>
    %c0_39 = arith.constant 0 : index
    %c0_40 = arith.constant 0 : index
    %c5 = arith.constant 5 : index
    %c0_41 = arith.constant 0 : index
    %74 = vector.load %arg9[%c0_39, %c0_40, %c5, %c0_41] : memref<1x16x8x8xf32, #tpu.memory_space<vmem>>, vector<1x16x1x8xf32>
    %75 = vector.shape_cast %74 : vector<1x16x1x8xf32> to vector<16x8xf32>
    %76 = vector.shape_cast %73 : vector<16x8xf32> to vector<1x16x1x8xf32>
    tpu.vector_store %arg9[%c0_39, %c0_40, %c5, %c0_41], %76 {strides = array<i32>} : memref<1x16x8x8xf32, #tpu.memory_space<vmem>>, vector<1x16x1x8xf32>,
    %77 = vector.extract_strided_slice %7 {offsets = [0, 6], sizes = [96, 1], strides = [1, 1]} : vector<96x8xf32> to vector<96x1xf32>
    %78 = vector.broadcast %77 : vector<96x1xf32> to vector<96x8xf32>
    %79 = arith.addf %78, %8 : vector<96x8xf32>
    %cst_42 = arith.constant 0.000000e+00 : f32
    %80 = vector.broadcast %cst_42 : f32 to vector<96x8xf32>
    %81 = arith.maximumf %79, %80 : vector<96x8xf32>
    %cst_43 = arith.constant dense<0.000000e+00> : vector<16x8xf32>
    %82 = tpu.matmul %9, %81, %cst_43 {dimension_numbers = #tpu.dot_dimension_numbers<[1], [0], [0], [1], [0, 0, 1, 1], [], []>} : vector<16x96xf32>, vector<96x8xf32>, vector<16x8xf32> -> vector<16x8xf32>
    %83 = vector.broadcast %10 : vector<16x1xf32> to vector<16x8xf32>
    %84 = arith.addf %82, %83 : vector<16x8xf32>
    %c0_44 = arith.constant 0 : index
    %c0_45 = arith.constant 0 : index
    %c6 = arith.constant 6 : index
    %c0_46 = arith.constant 0 : index
    %85 = vector.load %arg9[%c0_44, %c0_45, %c6, %c0_46] : memref<1x16x8x8xf32, #tpu.memory_space<vmem>>, vector<1x16x1x8xf32>
    %86 = vector.shape_cast %85 : vector<1x16x1x8xf32> to vector<16x8xf32>
    %87 = vector.shape_cast %84 : vector<16x8xf32> to vector<1x16x1x8xf32>
    tpu.vector_store %arg9[%c0_44, %c0_45, %c6, %c0_46], %87 {strides = array<i32>} : memref<1x16x8x8xf32, #tpu.memory_space<vmem>>, vector<1x16x1x8xf32>,
    %88 = vector.extract_strided_slice %7 {offsets = [0, 7], sizes = [96, 1], strides = [1, 1]} : vector<96x8xf32> to vector<96x1xf32>
    %89 = vector.broadcast %88 : vector<96x1xf32> to vector<96x8xf32>
    %90 = arith.addf %89, %8 : vector<96x8xf32>
    %cst_47 = arith.constant 0.000000e+00 : f32
    %91 = vector.broadcast %cst_47 : f32 to vector<96x8xf32>
    %92 = arith.maximumf %90, %91 : vector<96x8xf32>
    %cst_48 = arith.constant dense<0.000000e+00> : vector<16x8xf32>
    %93 = tpu.matmul %9, %92, %cst_48 {dimension_numbers = #tpu.dot_dimension_numbers<[1], [0], [0], [1], [0, 0, 1, 1], [], []>} : vector<16x96xf32>, vector<96x8xf32>, vector<16x8xf32> -> vector<16x8xf32>
    %94 = vector.broadcast %10 : vector<16x1xf32> to vector<16x8xf32>
    %95 = arith.addf %93, %94 : vector<16x8xf32>
    %c0_49 = arith.constant 0 : index
    %c0_50 = arith.constant 0 : index
    %c7 = arith.constant 7 : index
    %c0_51 = arith.constant 0 : index
    %96 = vector.load %arg9[%c0_49, %c0_50, %c7, %c0_51] : memref<1x16x8x8xf32, #tpu.memory_space<vmem>>, vector<1x16x1x8xf32>
    %97 = vector.shape_cast %96 : vector<1x16x1x8xf32> to vector<16x8xf32>
    %98 = vector.shape_cast %95 : vector<16x8xf32> to vector<1x16x1x8xf32>
    tpu.vector_store %arg9[%c0_49, %c0_50, %c7, %c0_51], %98 {strides = array<i32>} : memref<1x16x8x8xf32, #tpu.memory_space<vmem>>, vector<1x16x1x8xf32>,
    return
  }
  func.func @transform_0(%arg0: i32, %arg1: i32) -> (i32, i32, i32) {
    %c0_i32 = arith.constant 0 : i32
    %c0_i32_0 = arith.constant 0 : i32
    %c0_i32_1 = arith.constant 0 : i32
    return %arg0, %c0_i32, %c0_i32_0 : i32, i32, i32
  }
  func.func @transform_1(%arg0: i32, %arg1: i32) -> (i32, i32, i32) {
    %c0_i32 = arith.constant 0 : i32
    %c0_i32_0 = arith.constant 0 : i32
    return %arg0, %arg1, %c0_i32 : i32, i32, i32
  }
  func.func @transform_2(%arg0: i32, %arg1: i32) -> (i32, i32) {
    %c0_i32 = arith.constant 0 : i32
    %c0_i32_0 = arith.constant 0 : i32
    %c0_i32_1 = arith.constant 0 : i32
    return %c0_i32, %c0_i32_0 : i32, i32
  }
  func.func @transform_3(%arg0: i32, %arg1: i32) -> (i32, i32) {
    %c0_i32 = arith.constant 0 : i32
    %c0_i32_0 = arith.constant 0 : i32
    %c0_i32_1 = arith.constant 0 : i32
    return %c0_i32, %c0_i32_0 : i32, i32
  }
  func.func @transform_4(%arg0: i32, %arg1: i32) -> (i32, i32) {
    %c0_i32 = arith.constant 0 : i32
    %c0_i32_0 = arith.constant 0 : i32
    %c0_i32_1 = arith.constant 0 : i32
    return %c0_i32, %c0_i32_0 : i32, i32
  }
  func.func @transform_5(%arg0: i32, %arg1: i32) -> (i32, i32) {
    %c0_i32 = arith.constant 0 : i32
    %c0_i32_0 = arith.constant 0 : i32
    %c0_i32_1 = arith.constant 0 : i32
    return %c0_i32, %c0_i32_0 : i32, i32
  }
  func.func @transform_6(%arg0: i32, %arg1: i32) -> (i32, i32) {
    %c0_i32 = arith.constant 0 : i32
    %c0_i32_0 = arith.constant 0 : i32
    %c0_i32_1 = arith.constant 0 : i32
    return %c0_i32, %c0_i32_0 : i32, i32
  }
  func.func @transform_7(%arg0: i32, %arg1: i32) -> (i32, i32, i32, i32) {
    %c0_i32 = arith.constant 0 : i32
    %c0_i32_0 = arith.constant 0 : i32
    %c0_i32_1 = arith.constant 0 : i32
    return %arg0, %c0_i32, %arg1, %c0_i32_0 : i32, i32, i32, i32
  }
}

</mosaic_0001>

<bundles_post_ra>
// kernel: tpu_custom_call.1
= control target key start
LH: loop header
LB: loop body
LE: loop exit
PB: predicated region body
PF: predicated region fallthrough
CT: control target
= control target key end

     0   :  { %s3913_s24 = smov 0   ;;  %s3915_s25 = smov 0   ;;  %s4962_s0 = inlined_call_operand.vmem [shape: f32[2,32,8], index: 0, kind: input, shape index: {}]   ;;  %s4963_s1 = inlined_call_operand.vmem [shape: f32[2,8,32], index: 1, kind: input, shape index: {}]   ;;  %s4964_s2 = inlined_call_operand.vmem [shape: f32[32,96], index: 2, kind: input, shape index: {}]   ;;  %s4965_s3 = inlined_call_operand.vmem [shape: f32[96,32], index: 3, kind: input, shape index: {}]   ;;  %s4966_s4 = inlined_call_operand.vmem [shape: f32[96,1], index: 4, kind: input, shape index: {}]   ;;  %s4967_s5 = inlined_call_operand.vmem [shape: f32[16,96], index: 5, kind: input, shape index: {}]   ;;  %s4968_s6 = inlined_call_operand.vmem [shape: f32[16,1], index: 6, kind: input, shape index: {}]   ;;  %s4969_s7 = inlined_call_operand.vmem [shape: f32[2,16,8,8], index: 7, kind: output, shape index: {}]  }
   0x1   :  { %s3917_s26 = smov 0  }
   0x2 LB: > { %s29_s27 = sadd.s32 1, %s3855_s25  ;;  %p3079_p0 = scmp.ge.s32.totalorder %s3859_s26, 1  ;;  %s3859_s26 = sphi %s3917_s26, %s17_s26   ;;  %s3855_s25 = sphi %s3915_s25, %s4974_s25   ;;  %s3851_s24 = sphi %s3913_s24, %s4973_s24  }
   0x3   : > { %p31_p1 = scmp.ge.s32.totalorder %s29_s27, 2  ;;  %p265_p2 = scmp.lt.s32.totalorder %s3859_s26, 3 }
   0x5   : > { %s4976_s27 = smov (%p31_p1, %s29_s27), 0  ;;  %p266_p3 = pnand %p3079_p0, %p265_p2 }
   0x7   : > { %269 = sbr.rel (%p266_p3) target bundleno = 1076 (0x434), region = 48 }
   0xe   : > { %v595_v0 = vld [vmem:[%s4964_s2] sm:$0xff]  ;;  %v596_v1 = vld [vmem:[%s4964_s2 + $0x8] sm:$0xff]  ;;  %v597_v2 = vld [vmem:[%s4964_s2 + $0x10] sm:$0xff]  ;;  %v3861_v3 = vmov 0.0|0.0   ;;  %vm3862_vm0 = vmmov 0   ;;  %v3863_v6 = vmov 0.0  }
   0xf   : > { %3512 = vmatprep.subr.bf16.mxu1 %v3861_v3  ;;  %v3513_v4 = vpack.c.bf16 %v596_v1, %v595_v0  ;;  %v598_v5 = vld [vmem:[%s4964_s2 + $0x18] sm:$0xff]  ;;  %3285 = vmatprep.mubr.msk.f32.mxu1 %vm3862_vm0, %v3863_v6  ;;  %p307_p4 = scmp.lt.s32.totalorder %s3851_s24, 1  ;;  %vm419_vm1 = vcmask 261120   ;;  %v331_v7 = vld [vmem:[%s4965_s3] sm:$0xff]  ;;  %v3864_v8 = vmov 0   ;;  %v348_v12 = vld [vmem:[%s4966_s4 + $0x8] sm:$0xff] }
  0x10   : > { %3259 = vmatprep.mubr.msk.f32.mxu0 %vm419_vm1, %v331_v7  ;;  %3746 = vset.pattern.permute.xlu0 %v3864_v8  ;;  %v3516_v9 = vpack.c.bf16 %v598_v5, %v597_v2  ;;  %v347_v10 = vld [vmem:[%s4966_s4] sm:$0xff]  ;;  %v353_v20 = vld [vmem:[%s4966_s4 + $0x30] sm:$0xff]  ;;  %v332_v21 = vld [vmem:[%s4965_s3 + $0x8] sm:$0xff]  ;;  %vm581_vm2 = vcmask 64512   ;;  %v3865_v2 = vmov 4   ;;  %vm815_vm3 = vcmask 785408  }
  0x11   : > { %3514 = vmatpush3.bf16.msra.mxu1 %v3513_v4  ;;  %s4978_s24 = smov (!%p307_p4, %s3851_s24), 1  ;;  %3747 = vset.pattern.permute.xlu1 %v3864_v8  ;;  %v351_v19 = vld [vmem:[%s4966_s4 + $0x20] sm:$0xff]  ;;  %v333_v22 = vld [vmem:[%s4965_s3 + $0x10] sm:$0xff]  ;;  %v334_v24 = vld [vmem:[%s4965_s3 + $0x18] sm:$0xff]  ;;  %vm1013_vm4 = vcmask 57344  }
  0x12   : > { %3515 = vmatprep.subr.bf16.mxu1 %v3861_v3  ;;  %s3082_s15 = sshll.u32 %s4978_s24, 3  ;;  %361 = vperm.xlu0 %3746, %v347_v10   ;;  %s3116_s21 = sshll.u32 %s4978_s24, 5  ;;  %v355_v23 = vld [vmem:[%s4966_s4 + $0x40] sm:$0xff]  ;;  %v357_v26 = vld [vmem:[%s4966_s4 + $0x50] sm:$0xff]  ;;  %v336_v27 = vld [vmem:[%s4965_s3 + $0x28] sm:$0xff] }
  0x13   : > { %s318_s20 = scalar_lea.vmem %s4963_s1, %s3082_s15  ;;  %s311_s30 = scalar_lea.vmem %s4962_s0, %s3116_s21  ;;  %v335_v25 = vld [vmem:[%s4965_s3 + $0x20] sm:$0xff]  ;;  %v337_v28 = vld [vmem:[%s4965_s3 + $0x30] sm:$0xff]  ;;  %v338_v29 = vld [vmem:[%s4965_s3 + $0x38] sm:$0xff] }
  0x14   : > { %v594_v11 = vld [vmem:[%s318_s20] sm:$0xff]  ;;  %v344_v14 = vld [vmem:[%s311_s30 + $0x8] sm:$0xff]  ;;  %v345_v15 = vld [vmem:[%s311_s30 + $0x10] sm:$0xff]  ;;  %s3117_s20 = sshll.u32 %s4978_s24, 7 }
  0x15   : > { %3517 = vmatpush3.bf16.msra.mxu1 %v3516_v9  ;;  %v343_v13 = vld [vmem:[%s311_s30] sm:$0xff]  ;;  %v346_v17 = vld [vmem:[%s311_s30 + $0x18] sm:$0xff]  ;;  %v340_v31 = vld [vmem:[%s4965_s3 + $0x48] sm:$0xff]  ;;  %s4586_s23 = scalar_lea.vmem %s4969_s7, %s3117_s20 }
  0x16   : > { %v3504_v16 = vpack.c.bf16 %v344_v14, %v343_v13  ;;  %366 = vperm.xlu0 %3746, %v348_v12   ;;  %v3508_v18 = vpack.c.bf16 %v346_v17, %v345_v15  ;;  %v339_v30 = vld [vmem:[%s4965_s3 + $0x40] sm:$0xff]  ;;  %v341_v32 = vld [vmem:[%s4965_s3 + $0x50] sm:$0xff]  ;;  %v342_v33 = vld [vmem:[%s4965_s3 + $0x58] sm:$0xff] }
  0x17   : > { %v349_v34 = vld [vmem:[%s4966_s4 + $0x10] sm:$0xff]  ;;  %v350_v35 = vld [vmem:[%s4966_s4 + $0x18] sm:$0xff]  ;;  %v352_v36 = vld [vmem:[%s4966_s4 + $0x28] sm:$0xff] }
  0x18   : > { %3286 = vmatmul.mubr.msk.f32.vlgmr.msra.gmra.mrb[0].mxu1 %vm419_vm1, %v594_v11  ;;  %3505 = vmatprep.subr.bf16.mxu0 %v3504_v16  ;;  %v354_v37 = vld [vmem:[%s4966_s4 + $0x38] sm:$0xff]  ;;  %v356_v38 = vld [vmem:[%s4966_s4 + $0x48] sm:$0xff] }
  0x19   : > { %3507 = vmatpush3.bf16.msra.mxu0 %v3504_v16  ;;  %371 = vperm.xlu1 %3747, %v349_v34   ;;  %v358_v39 = vld [vmem:[%s4966_s4 + $0x58] sm:$0xff] }
  0x1a   : > { %3509 = vmatprep.subr.bf16.mxu0 %v3508_v18  ;;  %381 = vperm.xlu0 %3746, %v351_v19  }
  0x1d   : > { %3511 = vmatpush3.bf16.msra.mxu0 %v3508_v18  ;;  %376 = vperm.xlu1 %3747, %v350_v35   ;;  %v3866_v18 = vmov 1  }
  0x1e   : > { %391 = vperm.xlu0 %3746, %v353_v20   ;;  %v3867_v20 = vmov 3  }
  0x20   : > { %3260 = vmatmul.mubr.msk.f32.vlgmr.msra.gmra.mrb[0].mxu0 %vm419_vm1, %v332_v21  ;;  %v3868_v21 = vmov 2  }
  0x21   : > { %3262 = vmatprep.mubr.msk.f32.mxu0 %vm419_vm1, %v333_v22  ;;  %386 = vperm.xlu1 %3747, %v352_v36  }
  0x22   : > { %401 = vperm.xlu0 %3746, %v355_v23   ;;  %v3869_v23 = vmov 5  }
  0x24   : > { %3263 = vmatmul.mubr.msk.f32.gmra.mrb[2].mxu0 %vm419_vm1, %v334_v24 }
  0x25   : > { %3265 = vmatprep.mubr.msk.f32.mxu0 %vm419_vm1, %v335_v25  ;;  %396 = vperm.xlu1 %3747, %v354_v37  }
  0x26   : > { %411 = vperm.xlu0 %3746, %v357_v26   ;;  %v3870_v26 = vmov 6  }
  0x28   : > { %3266 = vmatmul.mubr.msk.f32.gmra.mrb[4].mxu0 %vm419_vm1, %v336_v27 }
  0x29   : > { %3268 = vmatprep.mubr.msk.f32.mxu0 %vm419_vm1, %v337_v28  ;;  %406 = vperm.xlu1 %3747, %v356_v38  }
  0x2c   : > { %3269 = vmatmul.mubr.msk.f32.gmra.mrb[6].mxu0 %vm419_vm1, %v338_v29 }
  0x2d   : > { %3271 = vmatprep.mubr.msk.f32.mxu0 %vm419_vm1, %v339_v30  ;;  %416 = vperm.xlu1 %3747, %v358_v39  }
  0x30   : > { %3272 = vmatmul.mubr.msk.f32.gmra.mrb[8].mxu0 %vm419_vm1, %v340_v31 }
  0x31   : > { %3274 = vmatprep.mubr.msk.f32.mxu0 %vm419_vm1, %v341_v32  ;;  %v3871_v32 = vmov 7  }
  0x34   : > { %3275 = vmatmul.mubr.msk.f32.gmra.mrb[10].mxu0 %vm419_vm1, %v342_v33 }
  0x91   : > { %v362_v40 = vpop.permute.xlu0 %361 }
  0x95   : > { %v367_v43 = vpop.permute.xlu0 %366 }
  0x98   : > { %v372_v3 = vpop.permute.xlu1 %371 }
  0x99   : > { %v382_v45 = vpop.permute.xlu0 %381 }
  0x9c   : > { %v377_v5 = vpop.permute.xlu1 %376 }
  0x9d   : > { %v392_v51 = vpop.permute.xlu0 %391 }
  0xa0   : > { %v387_v7 = vpop.permute.xlu1 %386 }
  0xa1   : > { %v402_v56 = vpop.permute.xlu0 %401 }
  0xa4   : > { %v397_v10 = vpop.permute.xlu1 %396 }
  0xa5   : > { %v412_v62 = vpop.permute.xlu0 %411 }
  0xa8   : > { %v407_v12 = vpop.permute.xlu1 %406 }
  0xac   : > { %v417_v14 = vpop.permute.xlu1 %416 }
  0xeb   : > { %v669_v41 = vpop.f32.mrb[0].mxu1 }
  0xec   : > { %673 = vxpose.xlu0.b32.start.end [1/1] (short) (narrow) %v669_v41, 96  ;;  %v3287_v42 = vpop.f32.mrb[1].mxu1 }
  0xf3   : > { %v3261_v44 = vpop.f32.mrb[0].mxu0 }
  0xf4   : > { %v528_v46 = vadd.f32 %v3261_v44, %v367_v43  ;;  %v522_v47 = vpop.f32.mrb[1].mxu0 }
  0xf5   : > { %v523_v48 = vadd.f32 %v522_v47, %v362_v40 }
  0xf6   : > { %583 = vst.msk [vmem:[#allocation2 + $0x8] sm:$0xff] %vm581_vm2, %v528_v46 }
  0xf7   : > { %582 = vst.msk [vmem:[#allocation2] sm:$0xff] %vm581_vm2, %v523_v48  ;;  %v3264_v49 = vpop.f32.mrb[2].mxu0 }
  0xf8   : > { %v532_v50 = vpop.f32.mrb[3].mxu0  ;;  %v538_v6 = vadd.f32 %v3264_v49, %v377_v5 }
  0xf9   : > { %v533_v4 = vadd.f32 %v532_v50, %v372_v3 }
  0xfa   : > { %585 = vst.msk [vmem:[#allocation2 + $0x18] sm:$0xff] %vm581_vm2, %v538_v6 }
  0xfb   : > { %v3267_v52 = vpop.f32.mrb[4].mxu0  ;;  %584 = vst.msk [vmem:[#allocation2 + $0x10] sm:$0xff] %vm581_vm2, %v533_v4 }
  0xfc   : > { %v542_v53 = vpop.f32.mrb[5].mxu0  ;;  %v548_v9 = vadd.f32 %v3267_v52, %v387_v7 }
  0xfd   : > { %v543_v54 = vadd.f32 %v542_v53, %v382_v45  ;;  %v4199_v42 = vld [vmem:[#allocation2 + $0x8] sm:$0xff] }
  0xfe   : > { %587 = vst.msk [vmem:[#allocation2 + $0x28] sm:$0xff] %vm581_vm2, %v548_v9  ;;  %v4195_v40 = vld [vmem:[#allocation2] sm:$0xff] }
  0xff   : > { %586 = vst.msk [vmem:[#allocation2 + $0x20] sm:$0xff] %vm581_vm2, %v543_v54  ;;  %v3270_v55 = vpop.f32.mrb[6].mxu0 }
 0x100   : > { %v552_v57 = vpop.f32.mrb[7].mxu0  ;;  %v558_v11 = vadd.f32 %v3270_v55, %v397_v10 }
 0x101   : > { %v553_v58 = vadd.f32 %v552_v57, %v392_v51 }
 0x102   : > { %589 = vst.msk [vmem:[#allocation2 + $0x38] sm:$0xff] %vm581_vm2, %v558_v11 }
 0x103   : > { %588 = vst.msk [vmem:[#allocation2 + $0x30] sm:$0xff] %vm581_vm2, %v553_v58  ;;  %v3273_v59 = vpop.f32.mrb[8].mxu0 }
 0x104   : > { %v562_v60 = vpop.f32.mrb[9].mxu0  ;;  %v568_v13 = vadd.f32 %v3273_v59, %v407_v12 }
 0x105   : > { %v563_v61 = vadd.f32 %v562_v60, %v402_v56  ;;  %v4227_v60 = vld [vmem:[#allocation2 + $0x10] sm:$0xff] }
 0x106   : > { %591 = vst.msk [vmem:[#allocation2 + $0x48] sm:$0xff] %vm581_vm2, %v568_v13 }
 0x107   : > { %590 = vst.msk [vmem:[#allocation2 + $0x40] sm:$0xff] %vm581_vm2, %v563_v61  ;;  %v3276_v63 = vpop.f32.mrb[10].mxu0 }
 0x108   : > { %v572_v0 = vpop.f32.mrb[11].mxu0  ;;  %v578_v15 = vadd.f32 %v3276_v63, %v417_v14  ;;  %v4231_v63 = vld [vmem:[#allocation2 + $0x18] sm:$0xff] }
 0x109   : > { %v573_v1 = vadd.f32 %v572_v0, %v412_v62 }
 0x10a   : > { %593 = vst.msk [vmem:[#allocation2 + $0x58] sm:$0xff] %vm581_vm2, %v578_v15 }
 0x10b   : > { %592 = vst.msk [vmem:[#allocation2 + $0x50] sm:$0xff] %vm581_vm2, %v573_v1 }
 0x115   : > { %3758 = vset.pattern.permute.xlu0 %v3865_v2 }
 0x16c   : > { %v4053_v16 = vpop.trf.xlu0 }
 0x16d   : > { %723 = vperm.xlu1 %3747, %v4053_v16  }
 0x170   : > { %v4056_v17 = vpop.trf.xlu0 }
 0x171   : > { %3748 = vset.pattern.permute.xlu1 %v3866_v18  ;;  %1872 = vperm.xlu0 %3758, %v4056_v17  }
 0x172   : > { %1031 = vperm.xlu1 %3748, %v4053_v16  }
 0x174   : > { %v4061_v19 = vpop.trf.xlu0 }
 0x175   : > { %3763 = vset.pattern.permute.xlu0 %v3867_v20 }
 0x176   : > { %3749 = vset.pattern.permute.xlu1 %v3868_v21  ;;  %1597 = vperm.xlu0 %3763, %v4061_v19  }
 0x177   : > { %1310 = vperm.xlu1 %3749, %v4053_v16  }
 0x178   : > { %v4070_v22 = vpop.trf.xlu0 }
 0x17a   : > { %3764 = vset.pattern.permute.xlu0 %v3865_v2 }
 0x17b   : > { %3750 = vset.pattern.permute.xlu1 %v3867_v20  ;;  %1876 = vperm.xlu0 %3764, %v4061_v19  }
 0x17c   : > { %1589 = vperm.xlu1 %3750, %v4053_v16   ;;  %v4077_v24 = vpop.trf.xlu0 }
 0x17f   : > { %3765 = vset.pattern.permute.xlu0 %v3869_v23 }
 0x180   : > { %3751 = vset.pattern.permute.xlu1 %v3865_v2  ;;  %2155 = vperm.xlu0 %3765, %v4061_v19   ;;  %v4083_v25 = vpop.trf.xlu0 }
 0x181   : > { %1868 = vperm.xlu1 %3751, %v4053_v16  }
 0x184   : > { %3772 = vset.pattern.permute.xlu0 %v3864_v8  ;;  %v4093_v27 = vpop.trf.xlu0 }
 0x185   : > { %3752 = vset.pattern.permute.xlu1 %v3869_v23  ;;  %743 = vperm.xlu0 %3772, %v4077_v24  }
 0x186   : > { %2147 = vperm.xlu1 %3752, %v4053_v16  }
 0x188   : > { %v4102_v28 = vpop.trf.xlu0 }
 0x189   : > { %3780 = vset.pattern.permute.xlu0 %v3868_v21 }
 0x18a   : > { %3753 = vset.pattern.permute.xlu1 %v3870_v26  ;;  %1330 = vperm.xlu0 %3780, %v4083_v25  }
 0x18b   : > { %2426 = vperm.xlu1 %3753, %v4053_v16  }
 0x18c   : > { %v4109_v29 = vpop.trf.xlu0 }
 0x18e   : > { %3782 = vset.pattern.permute.xlu0 %v3865_v2 }
 0x18f   : > { %3754 = vset.pattern.permute.xlu1 %v3864_v8  ;;  %1888 = vperm.xlu0 %3782, %v4083_v25  }
 0x190   : > { %728 = vperm.xlu1 %3754, %v4056_v17   ;;  %v4115_v30 = vpop.trf.xlu0 }
 0x193   : > { %3786 = vset.pattern.permute.xlu0 %v3868_v21 }
 0x194   : > { %3755 = vset.pattern.permute.xlu1 %v3866_v18  ;;  %1334 = vperm.xlu0 %3786, %v4093_v27   ;;  %v4125_v31 = vpop.trf.xlu0 }
 0x195   : > { %1035 = vperm.xlu1 %3755, %v4056_v17  }
 0x198   : > { %3787 = vset.pattern.permute.xlu0 %v3867_v20  ;;  %v4250_v15 = vpop.trf.xlu0 }
 0x199   : > { %3756 = vset.pattern.permute.xlu1 %v3868_v21  ;;  %1613 = vperm.xlu0 %3787, %v4093_v27  }
 0x19a   : > { %1314 = vperm.xlu1 %3756, %v4056_v17  }
 0x19d   : > { %3788 = vset.pattern.permute.xlu0 %v3865_v2 }
 0x19e   : > { %3757 = vset.pattern.permute.xlu1 %v3867_v20  ;;  %1892 = vperm.xlu0 %3788, %v4093_v27  }
 0x19f   : > { %1593 = vperm.xlu1 %3757, %v4056_v17  }
 0x1a2   : > { %3789 = vset.pattern.permute.xlu0 %v3869_v23 }
 0x1a3   : > { %3759 = vset.pattern.permute.xlu1 %v3869_v23  ;;  %2171 = vperm.xlu0 %3789, %v4093_v27  }
 0x1a4   : > { %2151 = vperm.xlu1 %3759, %v4056_v17  }
 0x1a7   : > { %3804 = vset.pattern.permute.xlu0 %v3868_v21 }
 0x1a8   : > { %3760 = vset.pattern.permute.xlu1 %v3864_v8  ;;  %1346 = vperm.xlu0 %3804, %v4115_v30  }
 0x1a9   : > { %733 = vperm.xlu1 %3760, %v4061_v19  }
 0x1ac   : > { %3806 = vset.pattern.permute.xlu0 %v3865_v2 }
 0x1ad   : > { %3761 = vset.pattern.permute.xlu1 %v3866_v18  ;;  %1904 = vperm.xlu0 %3806, %v4115_v30  }
 0x1ae   : > { %1039 = vperm.xlu1 %3761, %v4061_v19  }
 0x1b1   : > { %3810 = vset.pattern.permute.xlu0 %v3868_v21 }
 0x1b2   : > { %3762 = vset.pattern.permute.xlu1 %v3868_v21  ;;  %1350 = vperm.xlu0 %3810, %v4125_v31  }
 0x1b3   : > { %1318 = vperm.xlu1 %3762, %v4061_v19  }
 0x1b6   : > { %3811 = vset.pattern.permute.xlu0 %v3867_v20 }
 0x1b7   : > { %3766 = vset.pattern.permute.xlu1 %v3864_v8  ;;  %1629 = vperm.xlu0 %3811, %v4125_v31  }
 0x1b8   : > { %738 = vperm.xlu1 %3766, %v4070_v22  }
 0x1bb   : > { %3812 = vset.pattern.permute.xlu0 %v3865_v2 }
 0x1bc   : > { %3767 = vset.pattern.permute.xlu1 %v3866_v18  ;;  %1908 = vperm.xlu0 %3812, %v4125_v31  }
 0x1bd   : > { %1043 = vperm.xlu1 %3767, %v4070_v22  }
 0x1c0   : > { %3813 = vset.pattern.permute.xlu0 %v3869_v23 }
 0x1c1   : > { %3768 = vset.pattern.permute.xlu1 %v3868_v21  ;;  %2187 = vperm.xlu0 %3813, %v4125_v31  }
 0x1c2   : > { %1322 = vperm.xlu1 %3768, %v4070_v22  }
 0x1c5   : > { %3818 = vset.pattern.permute.xlu0 %v3871_v32 }
 0x1c6   : > { %3769 = vset.pattern.permute.xlu1 %v3867_v20  ;;  %2713 = vperm.xlu0 %3818, %v4061_v19  }
 0x1c7   : > { %1601 = vperm.xlu1 %3769, %v4070_v22  }
 0x1ca   : > { %2729 = vperm.xlu0 %3818, %v4093_v27  }
 0x1cb   : > { %3770 = vset.pattern.permute.xlu1 %v3865_v2 }
 0x1cc   : > { %1880 = vperm.xlu1 %3770, %v4070_v22  }
 0x1ce   : > { %3825 = vset.pattern.permute.xlu0 %v3870_v26 }
 0x1cf   : > { %2430 = vperm.xlu0 %3825, %v4056_v17  }
 0x1d0   : > { %3771 = vset.pattern.permute.xlu1 %v3869_v23 }
 0x1d1   : > { %2159 = vperm.xlu1 %3771, %v4070_v22  }
 0x1d3   : > { %2434 = vperm.xlu0 %3825, %v4061_v19  }
 0x1d5   : > { %3773 = vset.pattern.permute.xlu1 %v3866_v18 }
 0x1d6   : > { %1047 = vperm.xlu1 %3773, %v4077_v24  }
 0x1d7   : > { %2446 = vperm.xlu0 %3825, %v4083_v25  }
 0x1da   : > { %3774 = vset.pattern.permute.xlu1 %v3868_v21 }
 0x1db   : > { %1326 = vperm.xlu1 %3774, %v4077_v24   ;;  %2450 = vperm.xlu0 %3825, %v4093_v27  }
 0x1df   : > { %3775 = vset.pattern.permute.xlu1 %v3867_v20  ;;  %2462 = vperm.xlu0 %3825, %v4115_v30  }
 0x1e0   : > { %1605 = vperm.xlu1 %3775, %v4077_v24  }
 0x1e3   : > { %2466 = vperm.xlu0 %3825, %v4125_v31  }
 0x1e4   : > { %3776 = vset.pattern.permute.xlu1 %v3865_v2 }
 0x1e5   : > { %1884 = vperm.xlu1 %3776, %v4077_v24  }
 0x1e7   : > { %3831 = vset.pattern.permute.xlu0 %v3871_v32 }
 0x1e8   : > { %2745 = vperm.xlu0 %3831, %v4125_v31  }
 0x1e9   : > { %3777 = vset.pattern.permute.xlu1 %v3869_v23 }
 0x1ea   : > { %2163 = vperm.xlu1 %3777, %v4077_v24  }
 0x1ec   : > { %v724_v33 = vpop.permute.xlu1 %723  ;;  %3835 = vset.pattern.permute.xlu0 %v3864_v8 }
 0x1ed   : > { %v781_v41 = vadd.f32 %v724_v33, %v4195_v40 }
 0x1ee   : > { %3778 = vset.pattern.permute.xlu1 %v3864_v8 }
 0x1ef   : > { %748 = vperm.xlu1 %3778, %v4083_v25   ;;  %v793_v45 = vmax.f32 %v781_v41, 0.0 }
 0x1f1   : > { %v1032_v34 = vpop.permute.xlu1 %1031 }
 0x1f2   : > { %v1078_v47 = vadd.f32 %v1032_v34, %v4195_v40 }
 0x1f3   : > { %3779 = vset.pattern.permute.xlu1 %v3866_v18 }
 0x1f4   : > { %1051 = vperm.xlu1 %3779, %v4083_v25   ;;  %v1090_v51 = vmax.f32 %v1078_v47, 0.0 }
 0x1f6   : > { %v4176_v35 = vpop.permute.xlu1 %1310 }
 0x1f8   : > { %3781 = vset.pattern.permute.xlu1 %v3867_v20 }
 0x1f9   : > { %1609 = vperm.xlu1 %3781, %v4083_v25  }
 0x1fb   : > { %v4180_v36 = vpop.permute.xlu1 %1589 }
 0x1fd   : > { %3783 = vset.pattern.permute.xlu1 %v3869_v23 }
 0x1fe   : > { %2167 = vperm.xlu1 %3783, %v4083_v25  }
 0x200   : > { %v4184_v37 = vpop.permute.xlu1 %1868 }
 0x202   : > { %3784 = vset.pattern.permute.xlu1 %v3864_v8 }
 0x203   : > { %753 = vperm.xlu1 %3784, %v4093_v27  }
 0x205   : > { %v4188_v38 = vpop.permute.xlu1 %2147 }
 0x207   : > { %3785 = vset.pattern.permute.xlu1 %v3866_v18 }
 0x208   : > { %1055 = vperm.xlu1 %3785, %v4093_v27   ;;  %v4256_v27 = vpop.permute.xlu0 %1872 }
 0x20a   : > { %v4192_v39 = vpop.permute.xlu1 %2426 }
 0x20c   : > { %3790 = vset.pattern.permute.xlu1 %v3864_v8  ;;  %v4261_v34 = vpop.permute.xlu0 %1597 }
 0x20d   : > { %758 = vperm.xlu1 %3790, %v4102_v28  }
 0x20f   : > { %v729_v43 = vpop.permute.xlu1 %728 }
 0x210   : > { %v782_v44 = vadd.f32 %v729_v43, %v4199_v42  ;;  %v4268_v43 = vpop.permute.xlu0 %1876 }
 0x211   : > { %3791 = vset.pattern.permute.xlu1 %v3866_v18 }
 0x212   : > { %v794_v46 = vmax.f32 %v782_v44, 0.0  ;;  %1059 = vperm.xlu1 %3791, %v4102_v28  }
 0x214   : > { %v1036_v48 = vpop.permute.xlu1 %1035  ;;  %v3518_v49 = vpack.c.bf16 %v794_v46, %v793_v45  ;;  %v4272_v45 = vpop.permute.xlu0 %2155 }
 0x215   : > { %v1079_v50 = vadd.f32 %v1036_v48, %v4199_v42 }
 0x216   : > { %3792 = vset.pattern.permute.xlu1 %v3868_v21  ;;  %3519 = vmatprep.subr.bf16.mxu0 %v3518_v49 }
 0x217   : > { %v1091_v52 = vmax.f32 %v1079_v50, 0.0  ;;  %1338 = vperm.xlu1 %3792, %v4102_v28   ;;  %3521 = vmatpush3.bf16.msra.mxu0 %v3518_v49  ;;  %v4279_v49 = vld [vmem:[#allocation2 + $0x20] sm:$0xff] }
 0x218   : > { %v744_v48 = vpop.permute.xlu0 %743 }
 0x219   : > { %v4208_v53 = vpop.permute.xlu1 %1314  ;;  %v3542_v54 = vpack.c.bf16 %v1091_v52, %v1090_v51  ;;  %v785_v50 = vadd.f32 %v744_v48, %v4279_v49  ;;  %v4283_v51 = vld [vmem:[#allocation2 + $0x28] sm:$0xff] }
 0x21b   : > { %3793 = vset.pattern.permute.xlu1 %v3867_v20  ;;  %3543 = vmatprep.subr.bf16.mxu1 %v3542_v54 }
 0x21c   : > { %1617 = vperm.xlu1 %3793, %v4102_v28   ;;  %3545 = vmatpush3.bf16.msra.mxu1 %v3542_v54  ;;  %v4290_v54 = vld [vmem:[%s4967_s5] sm:$0xff] }
 0x21d   : > { %3312 = vmatprep.mubr.msk.f32.mxu0 %vm815_vm3, %v4290_v54  ;;  %3339 = vmatprep.mubr.msk.f32.mxu1 %vm815_vm3, %v4290_v54 }
 0x21e   : > { %v4212_v55 = vpop.permute.xlu1 %1593 }
 0x220   : > { %3794 = vset.pattern.permute.xlu1 %v3865_v2 }
 0x221   : > { %1896 = vperm.xlu1 %3794, %v4102_v28  }
 0x223   : > { %v4216_v56 = vpop.permute.xlu1 %2151 }
 0x225   : > { %3795 = vset.pattern.permute.xlu1 %v3869_v23 }
 0x226   : > { %2175 = vperm.xlu1 %3795, %v4102_v28  }
 0x228   : > { %v734_v57 = vpop.permute.xlu1 %733 }
 0x229   : > { %v783_v61 = vadd.f32 %v734_v57, %v4227_v60 }
 0x22a   : > { %3796 = vset.pattern.permute.xlu1 %v3864_v8 }
 0x22b   : > { %763 = vperm.xlu1 %3796, %v4109_v29   ;;  %v795_v1 = vmax.f32 %v783_v61, 0.0 }
 0x22d   : > { %v1040_v58 = vpop.permute.xlu1 %1039 }
 0x22e   : > { %v1080_v4 = vadd.f32 %v1040_v58, %v4227_v60 }
 0x22f   : > { %3797 = vset.pattern.permute.xlu1 %v3866_v18 }
 0x230   : > { %1063 = vperm.xlu1 %3797, %v4109_v29   ;;  %v1092_v9 = vmax.f32 %v1080_v4, 0.0 }
 0x232   : > { %v4224_v59 = vpop.permute.xlu1 %1318 }
 0x234   : > { %3798 = vset.pattern.permute.xlu1 %v3868_v21 }
 0x235   : > { %1342 = vperm.xlu1 %3798, %v4109_v29  }
 0x237   : > { %v739_v62 = vpop.permute.xlu1 %738 }
 0x238   : > { %v784_v0 = vadd.f32 %v739_v62, %v4231_v63 }
 0x239   : > { %3799 = vset.pattern.permute.xlu1 %v3867_v20 }
 0x23a   : > { %v796_v3 = vmax.f32 %v784_v0, 0.0  ;;  %1621 = vperm.xlu1 %3799, %v4109_v29  }
 0x23c   : > { %v1044_v5 = vpop.permute.xlu1 %1043  ;;  %v3522_v6 = vpack.c.bf16 %v796_v3, %v795_v1 }
 0x23d   : > { %v1081_v7 = vadd.f32 %v1044_v5, %v4231_v63 }
 0x23e   : > { %3800 = vset.pattern.permute.xlu1 %v3865_v2  ;;  %3523 = vmatprep.subr.bf16.mxu0 %v3522_v6 }
 0x23f   : > { %v1093_v10 = vmax.f32 %v1081_v7, 0.0  ;;  %1900 = vperm.xlu1 %3800, %v4109_v29   ;;  %3525 = vmatpush3.bf16.msra.mxu0 %v3522_v6 }
 0x241   : > { %v4240_v11 = vpop.permute.xlu1 %1322  ;;  %v3546_v12 = vpack.c.bf16 %v1093_v10, %v1092_v9 }
 0x243   : > { %3801 = vset.pattern.permute.xlu1 %v3869_v23  ;;  %3547 = vmatprep.subr.bf16.mxu1 %v3546_v12 }
 0x244   : > { %2179 = vperm.xlu1 %3801, %v4109_v29   ;;  %3549 = vmatpush3.bf16.msra.mxu1 %v3546_v12 }
 0x246   : > { %v4244_v13 = vpop.permute.xlu1 %1601 }
 0x248   : > { %3802 = vset.pattern.permute.xlu1 %v3864_v8 }
 0x249   : > { %768 = vperm.xlu1 %3802, %v4115_v30  }
 0x24b   : > { %v4248_v14 = vpop.permute.xlu1 %1880 }
 0x24d   : > { %3803 = vset.pattern.permute.xlu1 %v3866_v18 }
 0x24e   : > { %1067 = vperm.xlu1 %3803, %v4115_v30  }
 0x250   : > { %v4254_v19 = vpop.permute.xlu1 %2159 }
 0x252   : > { %3805 = vset.pattern.permute.xlu1 %v3867_v20 }
 0x253   : > { %1625 = vperm.xlu1 %3805, %v4115_v30  }
 0x255   : > { %v1048_v33 = vpop.permute.xlu1 %1047 }
 0x256   : > { %v1082_v58 = vadd.f32 %v1048_v33, %v4279_v49 }
 0x257   : > { %3807 = vset.pattern.permute.xlu1 %v3869_v23 }
 0x258   : > { %2183 = vperm.xlu1 %3807, %v4115_v30   ;;  %v1094_v1 = vmax.f32 %v1082_v58, 0.0 }
 0x25a   : > { %v4264_v41 = vpop.permute.xlu1 %1326 }
 0x25c   : > { %3808 = vset.pattern.permute.xlu1 %v3864_v8 }
 0x25d   : > { %773 = vperm.xlu1 %3808, %v4125_v31  }
 0x25f   : > { %v1606_v44 = vpop.permute.xlu1 %1605 }
 0x261   : > { %3809 = vset.pattern.permute.xlu1 %v3866_v18 }
 0x262   : > { %1071 = vperm.xlu1 %3809, %v4125_v31  }
 0x264   : > { %v4274_v46 = vpop.permute.xlu1 %1884 }
 0x266   : > { %3814 = vset.pattern.permute.xlu1 %v3864_v8 }
 0x267   : > { %778 = vperm.xlu1 %3814, %v4250_v15  }
 0x269   : > { %v2164_v47 = vpop.permute.xlu1 %2163 }
 0x26b   : > { %3815 = vset.pattern.permute.xlu1 %v3866_v18  ;;  %v797_v18 = vmax.f32 %v785_v50, 0.0 }
 0x26c   : > { %1075 = vperm.xlu1 %3815, %v4250_v15  }
 0x26e   : > { %v749_v31 = vpop.permute.xlu1 %748 }
 0x26f   : > { %v786_v52 = vadd.f32 %v749_v31, %v4283_v51 }
 0x270   : > { %3816 = vset.pattern.permute.xlu1 %v3871_v32 }
 0x271   : > { %v798_v57 = vmax.f32 %v786_v52, 0.0  ;;  %2705 = vperm.xlu1 %3816, %v4053_v16   ;;  %v1640_v16 = vadd.f32 %v1606_v44, %v4279_v49 }
 0x273   : > { %v3526_v61 = vpack.c.bf16 %v798_v57, %v797_v18  ;;  %v1052_v62 = vpop.permute.xlu1 %1051  ;;  %v1652_v7 = vmax.f32 %v1640_v16, 0.0 }
 0x274   : > { %v1083_v0 = vadd.f32 %v1052_v62, %v4283_v51 }
 0x275   : > { %2709 = vperm.xlu1 %3816, %v4056_v17   ;;  %3527 = vmatprep.subr.bf16.mxu0 %v3526_v61  ;;  %v2198_v17 = vadd.f32 %v2164_v47, %v4279_v49  ;;  %v4316_v47 = vld [vmem:[#allocation2 + $0x30] sm:$0xff] }
 0x276   : > { %v1095_v3 = vmax.f32 %v1083_v0, 0.0  ;;  %3529 = vmatpush3.bf16.msra.mxu0 %v3526_v61 }
 0x277   : > { %v2210_v44 = vmax.f32 %v2198_v17, 0.0 }
 0x278   : > { %v3550_v4 = vpack.c.bf16 %v1095_v3, %v1094_v1  ;;  %v1610_v5 = vpop.permute.xlu1 %1609 }
 0x279   : > { %v1641_v6 = vadd.f32 %v1610_v5, %v4283_v51  ;;  %3817 = vset.pattern.permute.xlu1 %v3870_v26 }
 0x27a   : > { %2438 = vperm.xlu1 %3817, %v4070_v22   ;;  %3551 = vmatprep.subr.bf16.mxu1 %v3550_v4 }
 0x27b   : > { %v1653_v9 = vmax.f32 %v1641_v6, 0.0  ;;  %3553 = vmatpush3.bf16.msra.mxu1 %v3550_v4 }
 0x27d   : > { %v4305_v10 = vpack.c.bf16 %v1653_v9, %v1652_v7  ;;  %v2168_v12 = vpop.permute.xlu1 %2167 }
 0x27e   : > { %v2199_v33 = vadd.f32 %v2168_v12, %v4283_v51  ;;  %3819 = vset.pattern.permute.xlu1 %v3871_v32 }
 0x27f   : > { %2717 = vperm.xlu1 %3819, %v4070_v22   ;;  %v4319_v22 = vld [vmem:[#allocation2 + $0x38] sm:$0xff] }
 0x280   : > { %v2211_v48 = vmax.f32 %v2199_v33, 0.0  ;;  %v4362_v33 = vld [vmem:[#allocation2 + $0x40] sm:$0xff] }
 0x282   : > { %v4310_v50 = vpack.c.bf16 %v2211_v48, %v2210_v44  ;;  %v754_v31 = vpop.permute.xlu1 %753 }
 0x283   : > { %3820 = vset.pattern.permute.xlu1 %v3868_v21  ;;  %v787_v18 = vadd.f32 %v754_v31, %v4316_v47 }
 0x284   : > { %1354 = vperm.xlu1 %3820, %v4250_v15  }
 0x285   : > { %v799_v21 = vmax.f32 %v787_v18, 0.0 }
 0x287   : > { %v1056_v52 = vpop.permute.xlu1 %1055 }
 0x288   : > { %3821 = vset.pattern.permute.xlu1 %v3867_v20  ;;  %v1084_v62 = vadd.f32 %v1056_v52, %v4316_v47 }
 0x289   : > { %1633 = vperm.xlu1 %3821, %v4250_v15  }
 0x28a   : > { %v1096_v3 = vmax.f32 %v1084_v62, 0.0 }
 0x28c   : > { %v759_v57 = vpop.permute.xlu1 %758 }
 0x28d   : > { %v788_v58 = vadd.f32 %v759_v57, %v4319_v22  ;;  %3822 = vset.pattern.permute.xlu1 %v3870_v26 }
 0x28e   : > { %2442 = vperm.xlu1 %3822, %v4077_v24  }
 0x28f   : > { %v800_v61 = vmax.f32 %v788_v58, 0.0 }
 0x291   : > { %v3530_v20 = vpack.c.bf16 %v800_v61, %v799_v21  ;;  %v1060_v0 = vpop.permute.xlu1 %1059 }
 0x292   : > { %v1085_v1 = vadd.f32 %v1060_v0, %v4319_v22  ;;  %3823 = vset.pattern.permute.xlu1 %v3871_v32 }
 0x293   : > { %2721 = vperm.xlu1 %3823, %v4077_v24   ;;  %3531 = vmatprep.subr.bf16.mxu0 %v3530_v20 }
 0x294   : > { %v1097_v16 = vmax.f32 %v1085_v1, 0.0  ;;  %3533 = vmatpush3.bf16.msra.mxu0 %v3530_v20 }
 0x296   : > { %v3554_v4 = vpack.c.bf16 %v1097_v16, %v1096_v3  ;;  %v4328_v5 = vpop.permute.xlu1 %1338 }
 0x297   : > { %2725 = vperm.xlu1 %3823, %v4083_v25  }
 0x298   : > { %3555 = vmatprep.subr.bf16.mxu1 %v3554_v4 }
 0x299   : > { %3557 = vmatpush3.bf16.msra.mxu1 %v3554_v4 }
 0x29b   : > { %v4331_v6 = vpop.permute.xlu1 %1617  ;;  %3824 = vset.pattern.permute.xlu1 %v3870_v26 }
 0x29c   : > { %2454 = vperm.xlu1 %3824, %v4102_v28  }
 0x2a0   : > { %v4335_v7 = vpop.permute.xlu1 %1896  ;;  %3826 = vset.pattern.permute.xlu1 %v3865_v2 }
 0x2a1   : > { %1912 = vperm.xlu1 %3826, %v4250_v15  }
 0x2a5   : > { %v4339_v24 = vpop.permute.xlu1 %2175  ;;  %3827 = vset.pattern.permute.xlu1 %v3869_v23 }
 0x2a6   : > { %2191 = vperm.xlu1 %3827, %v4250_v15  }
 0x2aa   : > { %v764_v25 = vpop.permute.xlu1 %763  ;;  %3828 = vset.pattern.permute.xlu1 %v3871_v32 }
 0x2ab   : > { %2733 = vperm.xlu1 %3828, %v4102_v28   ;;  %v4358_v28 = vpop.permute.xlu0 %1330 }
 0x2af   : > { %v1064_v9 = vpop.permute.xlu1 %1063  ;;  %3829 = vset.pattern.permute.xlu1 %v3870_v26 }
 0x2b0   : > { %2458 = vperm.xlu1 %3829, %v4109_v29   ;;  %v1086_v18 = vadd.f32 %v1064_v9, %v4362_v33 }
 0x2b2   : > { %v1098_v62 = vmax.f32 %v1086_v18, 0.0 }
 0x2b4   : > { %v4347_v17 = vpop.permute.xlu1 %1342  ;;  %3830 = vset.pattern.permute.xlu1 %v3871_v32 }
 0x2b5   : > { %2737 = vperm.xlu1 %3830, %v4109_v29   ;;  %v789_v29 = vadd.f32 %v764_v25, %v4362_v33 }
 0x2b7   : > { %v801_v31 = vmax.f32 %v789_v29, 0.0 }
 0x2b9   : > { %v4351_v2 = vpop.permute.xlu1 %1621  ;;  %2741 = vperm.xlu1 %3830, %v4115_v30   ;;  %v4366_v30 = vpop.permute.xlu0 %1888 }
 0x2bd   : > { %3832 = vset.pattern.permute.xlu1 %v3870_v26  ;;  %v4368_v26 = vld [vmem:[#allocation2 + $0x48] sm:$0xff]  ;;  %v4378_v21 = vpop.permute.xlu0 %1334 }
 0x2be   : > { %v4355_v23 = vpop.permute.xlu1 %1900  ;;  %2470 = vperm.xlu1 %3832, %v4250_v15  }
 0x2c1   : > { %v4384_v3 = vpop.permute.xlu0 %1613 }
 0x2c2   : > { %3833 = vset.pattern.permute.xlu1 %v3871_v32 }
 0x2c3   : > { %v2180_v12 = vpop.permute.xlu1 %2179  ;;  %2749 = vperm.xlu1 %3833, %v4250_v15   ;;  %v720_v15 = vld [vmem:[%s4968_s6 + $0x8] sm:$0xff] }
 0x2c4   : > { %812 = vperm.xlu0 %3835, %v720_v15   ;;  %v2202_v16 = vadd.f32 %v2180_v12, %v4362_v33 }
 0x2c5   : > { %v4388_v9 = vpop.permute.xlu0 %1892 }
 0x2c6   : > { %v2214_v29 = vmax.f32 %v2202_v16, 0.0 }
 0x2c7   : > { %3834 = vset.pattern.permute.xlu1 %v3864_v8  ;;  %v719_v8 = vld [vmem:[%s4968_s6] sm:$0xff] }
 0x2c8   : > { %v769_v44 = vpop.permute.xlu1 %768  ;;  %807 = vperm.xlu1 %3834, %v719_v8   ;;  %3836 = vset.pattern.permute.xlu0 %v3871_v32  ;;  %v4394_v32 = vld [vmem:[#allocation2 + $0x50] sm:$0xff]  ;;  %v4399_v8 = vld [vmem:[#allocation2 + $0x58] sm:$0xff] }
 0x2c9   : > { %v790_v48 = vadd.f32 %v769_v44, %v4368_v26 }
 0x2cb   : > { %v802_v52 = vmax.f32 %v790_v48, 0.0 }
 0x2cd   : > { %v3534_v57 = vpack.c.bf16 %v802_v52, %v801_v31  ;;  %v1068_v58 = vpop.permute.xlu1 %1067  ;;  %v4392_v52 = vpop.permute.xlu0 %2171 }
 0x2ce   : > { %v1087_v61 = vadd.f32 %v1068_v58, %v4368_v26 }
 0x2cf   : > { %3535 = vmatprep.subr.bf16.mxu0 %v3534_v57 }
 0x2d0   : > { %v1099_v20 = vmax.f32 %v1087_v61, 0.0  ;;  %3537 = vmatpush3.bf16.msra.mxu0 %v3534_v57  ;;  %v1358_v57 = vadd.f32 %v4208_v53, %v4199_v42  ;;  %v1357_v61 = vadd.f32 %v4176_v35, %v4195_v40  ;;  %v1637_v53 = vadd.f32 %v4212_v55, %v4199_v42 }
 0x2d1   : > { %v1347_v58 = vpop.permute.xlu0 %1346  ;;  %v1636_v35 = vadd.f32 %v4180_v36, %v4195_v40  ;;  %v4423_v36 = vld [vmem:[%s4967_s5 + $0x8] sm:$0xff] }
 0x2d2   : > { %v3558_v0 = vpack.c.bf16 %v1099_v20, %v1098_v62  ;;  %v4381_v1 = vpop.permute.xlu1 %1625  ;;  %v1370_v20 = vmax.f32 %v1358_v57, 0.0 }
 0x2d4   : > { %3559 = vmatprep.subr.bf16.mxu1 %v3558_v0 }
 0x2d5   : > { %3561 = vmatpush3.bf16.msra.mxu1 %v3558_v0  ;;  %v1360_v0 = vadd.f32 %v4240_v11, %v4231_v63  ;;  %v4413_v57 = vpop.permute.xlu0 %1904 }
 0x2d7   : > { %v2184_v4 = vpop.permute.xlu1 %2183 }
 0x2d8   : > { %v2203_v25 = vadd.f32 %v2184_v4, %v4368_v26 }
 0x2da   : > { %v2215_v44 = vmax.f32 %v2203_v25, 0.0 }
 0x2dc   : > { %v4390_v48 = vpack.c.bf16 %v2215_v44, %v2214_v29  ;;  %v774_v31 = vpop.permute.xlu1 %773  ;;  %v1369_v29 = vmax.f32 %v1357_v61, 0.0  ;;  %v1359_v44 = vadd.f32 %v4224_v59, %v4227_v60  ;;  %v1639_v61 = vadd.f32 %v4244_v13, %v4231_v63 }
 0x2dd   : > { %v791_v12 = vadd.f32 %v774_v31, %v4394_v32 }
 0x2de   : > { %4971 = vst [vmem:[#allocation3_spill] sm:$0xff] %v4390_v48  ;;  %v3566_v55 = vpack.c.bf16 %v1370_v20, %v1369_v29  ;;  %v1648_v20 = vmax.f32 %v1636_v35, 0.0  ;;  %v1351_v29 = vpop.permute.xlu0 %1350 }
 0x2df   : > { %v803_v16 = vmax.f32 %v791_v12, 0.0  ;;  %v1372_v12 = vmax.f32 %v1360_v0, 0.0  ;;  %v1371_v0 = vmax.f32 %v1359_v44, 0.0 }
 0x2e1   : > { %v1072_v18 = vpop.permute.xlu1 %1071 }
 0x2e2   : > { %v1088_v25 = vadd.f32 %v1072_v18, %v4394_v32  ;;  %v1649_v18 = vmax.f32 %v1637_v53, 0.0  ;;  %v1364_v53 = vadd.f32 %v4328_v5, %v4319_v22 }
 0x2e4   : > { %v1100_v59 = vmax.f32 %v1088_v25, 0.0  ;;  %v3570_v25 = vpack.c.bf16 %v1372_v12, %v1371_v0  ;;  %v1376_v12 = vmax.f32 %v1364_v53, 0.0 }
 0x2e6   : > { %v779_v15 = vpop.permute.xlu1 %778 }
 0x2e7   : > { %v792_v62 = vadd.f32 %v779_v15, %v4399_v8  ;;  %v1361_v15 = vadd.f32 %v4264_v41, %v4279_v49  ;;  %v1638_v41 = vadd.f32 %v4261_v34, %v4227_v60  ;;  %v1363_v34 = vadd.f32 %v4378_v21, %v4316_v47 }
 0x2e9   : > { %v804_v4 = vmax.f32 %v792_v62, 0.0  ;;  %v1373_v13 = vmax.f32 %v1361_v15, 0.0  ;;  %v1650_v35 = vmax.f32 %v1638_v41, 0.0  ;;  %v1365_v15 = vadd.f32 %v4347_v17, %v4362_v33 }
 0x2ea   : > { %v1645_v41 = vadd.f32 %v4381_v1, %v4368_v26 }
 0x2eb   : > { %v3538_v31 = vpack.c.bf16 %v804_v4, %v803_v16  ;;  %v1076_v48 = vpop.permute.xlu1 %1075 }
 0x2ec   : > { %v1089_v11 = vadd.f32 %v1076_v48, %v4399_v8  ;;  %v1362_v48 = vadd.f32 %v4358_v28, %v4283_v51  ;;  %v3590_v28 = vpack.c.bf16 %v1649_v18, %v1648_v20  ;;  %v1375_v18 = vmax.f32 %v1363_v34, 0.0 }
 0x2ed   : > { %3539 = vmatprep.subr.bf16.mxu0 %v3538_v31 }
 0x2ee   : > { %v1101_v62 = vmax.f32 %v1089_v11, 0.0  ;;  %3541 = vmatpush3.bf16.msra.mxu0 %v3538_v31  ;;  %v1651_v31 = vmax.f32 %v1639_v61, 0.0  ;;  %v1374_v44 = vmax.f32 %v1362_v48, 0.0  ;;  %v1366_v61 = vadd.f32 %v1347_v58, %v4368_v26 }
 0x2ef   : > { %3567 = vmatprep.subr.bf16.mxu0 %v3566_v55  ;;  %v3578_v17 = vpack.c.bf16 %v1376_v12, %v1375_v18 }
 0x2f0   : > { %v3562_v16 = vpack.c.bf16 %v1101_v62, %v1100_v59  ;;  %v4429_v4 = vpop.permute.xlu1 %2705  ;;  %v3574_v5 = vpack.c.bf16 %v1374_v44, %v1373_v13  ;;  %v3594_v21 = vpack.c.bf16 %v1651_v31, %v1650_v35  ;;  %v1642_v59 = vadd.f32 %v4384_v3, %v4316_v47  ;;  %v1630_v62 = vpop.permute.xlu0 %1629 }
 0x2f1   : > { %3313 = vmatmul.mubr.msk.f32.vlgmr.msra.gmra.mrb[12].mxu0 %vm815_vm3, %v4423_v36  ;;  %v1378_v58 = vmax.f32 %v1366_v61, 0.0  ;;  %v1644_v3 = vadd.f32 %v4351_v2, %v4362_v33  ;;  %v1367_v2 = vadd.f32 %v1351_v29, %v4394_v32  ;;  %v1916_v35 = vadd.f32 %v4256_v27, %v4199_v42 }
 0x2f2   : > { %3563 = vmatprep.subr.bf16.mxu1 %v3562_v16  ;;  %3569 = vmatpush3.bf16.msra.mxu0 %v3566_v55  ;;  %v1643_v55 = vadd.f32 %v4331_v6, %v4319_v22  ;;  %v1377_v6 = vmax.f32 %v1365_v15, 0.0  ;;  %v1654_v20 = vmax.f32 %v1642_v59, 0.0  ;;  %v2195_v29 = vadd.f32 %v4216_v56, %v4199_v42 }
 0x2f3   : > { %3565 = vmatpush3.bf16.msra.mxu1 %v3562_v16  ;;  %3571 = vmatprep.subr.bf16.mxu0 %v3570_v25  ;;  %v1656_v1 = vmax.f32 %v1644_v3, 0.0  ;;  %v1379_v15 = vmax.f32 %v1367_v2, 0.0  ;;  %v1928_v18 = vmax.f32 %v1916_v35, 0.0  ;;  %v1917_v27 = vadd.f32 %v4268_v43, %v4227_v60 }
 0x2f4   : > { %v4437_v11 = vpop.permute.xlu1 %2709  ;;  %3591 = vmatprep.subr.bf16.mxu1 %v3590_v28  ;;  %3366 = vmatprep.mubr.msk.f32.mxu0 %vm815_vm3, %v4290_v54  ;;  %v1655_v0 = vmax.f32 %v1643_v55, 0.0  ;;  %v3582_v16 = vpack.c.bf16 %v1378_v58, %v1377_v6  ;;  %v4459_v13 = vpop.permute.xlu0 %1908  ;;  %v1918_v55 = vadd.f32 %v4248_v14, %v4231_v63  ;;  %v1919_v56 = vadd.f32 %v4274_v46, %v4279_v49 }
 0x2f5   : > { %v2197_v43 = vadd.f32 %v4254_v19, %v4231_v63  ;;  %v1929_v3 = vmax.f32 %v1917_v27, 0.0 }
 0x2f6   : > { %3573 = vmatpush3.bf16.msra.mxu0 %v3570_v25  ;;  %3340 = vmatmul.mubr.msk.f32.vlgmr.msra.gmra.mrb[2].mxu1 %vm815_vm3, %v4423_v36  ;;  %v3602_v53 = vpack.c.bf16 %v1655_v0, %v1654_v20  ;;  %v1657_v25 = vmax.f32 %v1645_v41, 0.0  ;;  %v1930_v14 = vmax.f32 %v1918_v55, 0.0  ;;  %v2207_v41 = vmax.f32 %v2195_v29, 0.0 }
 0x2f7   : > { %3575 = vmatprep.subr.bf16.mxu0 %v3574_v5  ;;  %3593 = vmatpush3.bf16.msra.mxu1 %v3590_v28  ;;  %v1915_v28 = vadd.f32 %v4184_v37, %v4195_v40  ;;  %v2209_v2 = vmax.f32 %v2197_v43, 0.0  ;;  %v2201_v55 = vadd.f32 %v4339_v24, %v4319_v22  ;;  %v1924_v29 = vadd.f32 %v4413_v57, %v4368_v26 }
 0x2f8   : > { %3595 = vmatprep.subr.bf16.mxu1 %v3594_v21  ;;  %3393 = vmatprep.mubr.msk.f32.mxu1 %vm815_vm3, %v4290_v54  ;;  %v3606_v44 = vpack.c.bf16 %v1657_v25, %v1656_v1  ;;  %v1931_v1 = vmax.f32 %v1919_v56, 0.0  ;;  %v3618_v19 = vpack.c.bf16 %v1930_v14, %v1929_v3  ;;  %v1925_v56 = vadd.f32 %v4459_v13, %v4394_v32 }
 0x2f9   : > { %v4452_v48 = vpop.permute.xlu1 %2438 }
 0x2fa   : > { %3577 = vmatpush3.bf16.msra.mxu0 %v3574_v5  ;;  %v4469_v5 = vpop.permute.xlu0 %2187 }
 0x2fb   : > { %3579 = vmatprep.subr.bf16.mxu0 %v3578_v17  ;;  %3597 = vmatpush3.bf16.msra.mxu1 %v3594_v21  ;;  %v1646_v21 = vadd.f32 %v1630_v62, %v4394_v32  ;;  %v2204_v13 = vadd.f32 %v4469_v5, %v4394_v32 }
 0x2fc   : > { %3599 = vmatprep.subr.bf16.mxu1 %v4305_v10 }
 0x2fd   : > { %v1658_v58 = vmax.f32 %v1646_v21, 0.0  ;;  %v2200_v21 = vadd.f32 %v4392_v52, %v4316_v47 }
 0x2fe   : > { %v4461_v31 = vpop.permute.xlu1 %2717  ;;  %3581 = vmatpush3.bf16.msra.mxu0 %v3578_v17  ;;  %v2194_v17 = vadd.f32 %v4188_v38, %v4195_v40  ;;  %v4482_v0 = vpop.permute.xlu0 %2713  ;;  %v1920_v38 = vadd.f32 %v4366_v30, %v4283_v51 }
 0x2ff   : > { %3583 = vmatprep.subr.bf16.mxu0 %v3582_v16  ;;  %3601 = vmatpush3.bf16.msra.mxu1 %v4305_v10  ;;  %v1927_v10 = vmax.f32 %v1915_v28, 0.0  ;;  %v1922_v28 = vadd.f32 %v4335_v7, %v4319_v22 }
 0x300   : > { %3603 = vmatprep.subr.bf16.mxu1 %v3602_v53 }
 0x301   : > { %v3614_v62 = vpack.c.bf16 %v1928_v18, %v1927_v10  ;;  %v1923_v10 = vadd.f32 %v4355_v23, %v4362_v33 }
 0x302   : > { %3585 = vmatpush3.bf16.msra.mxu0 %v3582_v16  ;;  %v2196_v16 = vadd.f32 %v4272_v45, %v4227_v60  ;;  %v1921_v45 = vadd.f32 %v4388_v9, %v4316_v47 }
 0x303   : > { %v1355_v34 = vpop.permute.xlu1 %1354  ;;  %3605 = vmatpush3.bf16.msra.mxu1 %v3602_v53  ;;  %v2206_v53 = vmax.f32 %v2194_v17, 0.0  ;;  %v1935_v18 = vmax.f32 %v1923_v10, 0.0  ;;  %v2212_v17 = vmax.f32 %v2200_v21, 0.0 }
 0x304   : > { %v1368_v12 = vadd.f32 %v1355_v34, %v4399_v8  ;;  %3607 = vmatprep.subr.bf16.mxu1 %v3606_v44  ;;  %v4500_v34 = vpop.permute.xlu0 %2729  ;;  %v2208_v35 = vmax.f32 %v2196_v16, 0.0 }
 0x305   : > { %v3638_v30 = vpack.c.bf16 %v2207_v41, %v2206_v53 }
 0x306   : > { %v1380_v37 = vmax.f32 %v1368_v12, 0.0  ;;  %v1934_v12 = vmax.f32 %v1922_v28, 0.0  ;;  %v3642_v9 = vpack.c.bf16 %v2209_v2, %v2208_v35  ;;  %v2752_v2 = vadd.f32 %v4429_v4, %v4195_v40 }
 0x307   : > { %3609 = vmatpush3.bf16.msra.mxu1 %v3606_v44  ;;  %v1932_v44 = vmax.f32 %v1920_v38, 0.0  ;;  %v1937_v38 = vmax.f32 %v1925_v56, 0.0  ;;  %v2755_v35 = vadd.f32 %v4461_v31, %v4231_v63 }
 0x308   : > { %v3586_v61 = vpack.c.bf16 %v1380_v37, %v1379_v15  ;;  %v1634_v59 = vpop.permute.xlu1 %1633  ;;  %v1933_v37 = vmax.f32 %v1921_v45, 0.0  ;;  %v2431_v23 = vpop.permute.xlu0 %2430  ;;  %v2216_v45 = vmax.f32 %v2204_v13, 0.0  ;;  %v2764_v4 = vmax.f32 %v2752_v2, 0.0 }
 0x309   : > { %v1647_v6 = vadd.f32 %v1634_v59, %v4399_v8  ;;  %v3622_v7 = vpack.c.bf16 %v1932_v44, %v1931_v1  ;;  %v1936_v59 = vmax.f32 %v1924_v29, 0.0  ;;  %v2767_v31 = vmax.f32 %v2755_v35, 0.0 }
 0x30a   : > { %3587 = vmatprep.subr.bf16.mxu0 %v3586_v61  ;;  %v3626_v24 = vpack.c.bf16 %v1934_v12, %v1933_v37 }
 0x30b   : > { %v1659_v20 = vmax.f32 %v1647_v6, 0.0  ;;  %3589 = vmatpush3.bf16.msra.mxu0 %v3586_v61  ;;  %v2213_v61 = vmax.f32 %v2201_v55, 0.0  ;;  %v3630_v57 = vpack.c.bf16 %v1936_v59, %v1935_v18 }
 0x30c   : > { %3615 = vmatprep.subr.bf16.mxu0 %v3614_v62  ;;  %v2435_v52 = vpop.permute.xlu0 %2434 }
 0x30d   : > { %v3610_v25 = vpack.c.bf16 %v1659_v20, %v1658_v58  ;;  %v4492_v46 = vpop.permute.xlu1 %2442  ;;  %v3650_v6 = vpack.c.bf16 %v2213_v61, %v2212_v17  ;;  %v2473_v58 = vadd.f32 %v4192_v39, %v4195_v40  ;;  %v4972_v20 = vld [vmem:[#allocation3_spill] sm:$0xff]  ;;  %v2475_v1 = vadd.f32 %v2435_v52, %v4227_v60 }
 0x30e   : > { %3367 = vmatmul.mubr.msk.f32.vlgmr.msra.gmra.mrb[14].mxu0 %vm815_vm3, %v4423_v36  ;;  %v2477_v5 = vadd.f32 %v4492_v46, %v4279_v49  ;;  %v2754_v40 = vadd.f32 %v4482_v0, %v4227_v60 }
 0x30f   : > { %3611 = vmatprep.subr.bf16.mxu1 %v3610_v25  ;;  %3617 = vmatpush3.bf16.msra.mxu0 %v3614_v62  ;;  %v2474_v62 = vadd.f32 %v2431_v23, %v4199_v42  ;;  %v2485_v39 = vmax.f32 %v2473_v58, 0.0  ;;  %v2487_v12 = vmax.f32 %v2475_v1, 0.0 }
 0x310   : > { %3613 = vmatpush3.bf16.msra.mxu1 %v3610_v25  ;;  %3619 = vmatprep.subr.bf16.mxu0 %v3618_v19  ;;  %v2447_v3 = vpop.permute.xlu0 %2446  ;;  %v2753_v25 = vadd.f32 %v4437_v11, %v4199_v42  ;;  %v2489_v37 = vmax.f32 %v2477_v5, 0.0  ;;  %v2766_v60 = vmax.f32 %v2754_v40, 0.0 }
 0x311   : > { %3639 = vmatprep.subr.bf16.mxu1 %v3638_v30  ;;  %3420 = vmatprep.mubr.msk.f32.mxu0 %vm815_vm3, %v4290_v54  ;;  %v2486_v16 = vmax.f32 %v2474_v62, 0.0  ;;  %v2478_v10 = vadd.f32 %v2447_v3, %v4283_v51 }
 0x312   : > { %v4506_v15 = vpop.permute.xlu1 %2721  ;;  %v2765_v11 = vmax.f32 %v2753_v25, 0.0 }
 0x313   : > { %3621 = vmatpush3.bf16.msra.mxu0 %v3618_v19  ;;  %3394 = vmatmul.mubr.msk.f32.vlgmr.msra.gmra.mrb[4].mxu1 %vm815_vm3, %v4423_v36  ;;  %v2490_v23 = vmax.f32 %v2478_v10, 0.0  ;;  %v2756_v18 = vadd.f32 %v4506_v15, %v4279_v49  ;;  %v2758_v15 = vadd.f32 %v4500_v34, %v4316_v47 }
 0x314   : > { %3623 = vmatprep.subr.bf16.mxu0 %v3622_v7  ;;  %3641 = vmatpush3.bf16.msra.mxu1 %v3638_v30  ;;  %v2451_v42 = vpop.permute.xlu0 %2450 }
 0x315   : > { %3643 = vmatprep.subr.bf16.mxu1 %v3642_v9  ;;  %3447 = vmatprep.mubr.msk.f32.mxu1 %vm815_vm3, %v4290_v54  ;;  %v3670_v61 = vpack.c.bf16 %v2490_v23, %v2489_v37  ;;  %v2768_v52 = vmax.f32 %v2756_v18, 0.0 }
 0x316   : > { %v2726_v27 = vpop.permute.xlu1 %2725 }
 0x317   : > { %3625 = vmatpush3.bf16.msra.mxu0 %v3622_v7  ;;  %v2757_v21 = vadd.f32 %v2726_v27, %v4283_v51  ;;  %v3690_v51 = vpack.c.bf16 %v2767_v31, %v2766_v60 }
 0x318   : > { %3627 = vmatprep.subr.bf16.mxu0 %v3626_v24  ;;  %3645 = vmatpush3.bf16.msra.mxu1 %v3642_v9  ;;  %v2463_v0 = vpop.permute.xlu0 %2462 }
 0x319   : > { %3647 = vmatprep.subr.bf16.mxu1 %v4310_v50  ;;  %v2769_v27 = vmax.f32 %v2757_v21, 0.0  ;;  %v2482_v49 = vadd.f32 %v2463_v0, %v4368_v26 }
 0x31b   : > { %v2455_v14 = vpop.permute.xlu1 %2454  ;;  %3629 = vmatpush3.bf16.msra.mxu0 %v3626_v24  ;;  %v2479_v24 = vadd.f32 %v2451_v42, %v4316_v47  ;;  %v3694_v62 = vpack.c.bf16 %v2769_v27, %v2768_v52 }
 0x31c   : > { %3631 = vmatprep.subr.bf16.mxu0 %v3630_v57  ;;  %3649 = vmatpush3.bf16.msra.mxu1 %v4310_v50  ;;  %v2476_v50 = vadd.f32 %v4452_v48, %v4231_v63  ;;  %v3662_v48 = vpack.c.bf16 %v2486_v16, %v2485_v39  ;;  %v2480_v29 = vadd.f32 %v2455_v14, %v4319_v22  ;;  %v2467_v47 = vpop.permute.xlu0 %2466 }
 0x31d   : > { %3651 = vmatprep.subr.bf16.mxu1 %v3650_v6  ;;  %v3686_v63 = vpack.c.bf16 %v2765_v11, %v2764_v4  ;;  %v2491_v14 = vmax.f32 %v2479_v24, 0.0  ;;  %v2483_v13 = vadd.f32 %v2467_v47, %v4394_v32  ;;  %v903_v11 = vlaneseq }
 0x31e   : > { %v2488_v44 = vmax.f32 %v2476_v50, 0.0  ;;  %v2492_v59 = vmax.f32 %v2480_v29, 0.0 }
 0x31f   : > { %3633 = vmatpush3.bf16.msra.mxu0 %v3630_v57 }
 0x320   : > { %v1913_v41 = vpop.permute.xlu1 %1912  ;;  %3653 = vmatpush3.bf16.msra.mxu1 %v3650_v6  ;;  %v3666_v46 = vpack.c.bf16 %v2488_v44, %v2487_v12  ;;  %v2746_v1 = vpop.permute.xlu0 %2745 }
 0x321   : > { %v1926_v43 = vadd.f32 %v1913_v41, %v4399_v8  ;;  %3655 = vmatprep.subr.bf16.mxu1 %v4972_v20  ;;  %v2762_v2 = vadd.f32 %v2746_v1, %v4394_v32  ;;  %v3872_v32 = vmov 1966171168  }
 0x322   : > { %v901_v42 = vunpack.c.l.s4 %v3872_v32 }
 0x323   : > { %v1938_v53 = vmax.f32 %v1926_v43, 0.0  ;;  %v2494_v43 = vmax.f32 %v2482_v49, 0.0  ;;  %v2774_v44 = vmax.f32 %v2762_v2, 0.0 }
 0x324   : > { %3657 = vmatpush3.bf16.msra.mxu1 %v4972_v20  ;;  %v2770_v20 = vmax.f32 %v2758_v15, 0.0  ;;  %v902_v35 = vunpack.c.0.s8 %v901_v42 }
 0x325   : > { %v3634_v28 = vpack.c.bf16 %v1938_v53, %v1937_v38  ;;  %v2192_v19 = vpop.permute.xlu1 %2191 }
 0x326   : > { %v2205_v30 = vadd.f32 %v2192_v19, %v4399_v8 }
 0x327   : > { %3635 = vmatprep.subr.bf16.mxu0 %v3634_v28 }
 0x328   : > { %v2217_v7 = vmax.f32 %v2205_v30, 0.0  ;;  %3637 = vmatpush3.bf16.msra.mxu0 %v3634_v28  ;;  %v2495_v28 = vmax.f32 %v2483_v13, 0.0 }
 0x329   : > { %3663 = vmatprep.subr.bf16.mxu0 %v3662_v48 }
 0x32a   : > { %v3658_v55 = vpack.c.bf16 %v2217_v7, %v2216_v45  ;;  %v2734_v9 = vpop.permute.xlu1 %2733  ;;  %v904_v7 = vshrl.u32 %v903_v11, 7 }
 0x32b   : > { %3421 = vmatmul.mubr.msk.f32.vlgmr.msra.gmra.mrb[16].mxu0 %vm815_vm3, %v4423_v36  ;;  %v2759_v57 = vadd.f32 %v2734_v9, %v4319_v22  ;;  %v3674_v22 = vpack.c.bf16 %v2492_v59, %v2491_v14 }
 0x32c   : > { %3659 = vmatprep.subr.bf16.mxu1 %v3658_v55  ;;  %3665 = vmatpush3.bf16.msra.mxu0 %v3662_v48  ;;  %v4577_v10 = vsub.s32 %v902_v35, %v904_v7 }
 0x32d   : > { %3661 = vmatpush3.bf16.msra.mxu1 %v3658_v55  ;;  %3667 = vmatprep.subr.bf16.mxu0 %v3666_v46  ;;  %v2771_v41 = vmax.f32 %v2759_v57, 0.0 }
 0x32e   : > { %3687 = vmatprep.subr.bf16.mxu1 %v3686_v63  ;;  %3474 = vmatprep.mubr.msk.f32.mxu0 %vm815_vm3, %v4290_v54 }
 0x32f   : > { %v2459_v17 = vpop.permute.xlu1 %2458  ;;  %v3698_v34 = vpack.c.bf16 %v2771_v41, %v2770_v20 }
 0x330   : > { %v2481_v6 = vadd.f32 %v2459_v17, %v4362_v33  ;;  %3669 = vmatpush3.bf16.msra.mxu0 %v3666_v46  ;;  %3448 = vmatmul.mubr.msk.f32.vlgmr.msra.gmra.mrb[6].mxu1 %vm815_vm3, %v4423_v36 }
 0x331   : > { %3671 = vmatprep.subr.bf16.mxu0 %v3670_v61  ;;  %3689 = vmatpush3.bf16.msra.mxu1 %v3686_v63 }
 0x332   : > { %3691 = vmatprep.subr.bf16.mxu1 %v3690_v51  ;;  %3501 = vmatprep.mubr.msk.f32.mxu1 %vm815_vm3, %v4290_v54  ;;  %v2493_v56 = vmax.f32 %v2481_v6, 0.0 }
 0x334   : > { %v2738_v58 = vpop.permute.xlu1 %2737  ;;  %3673 = vmatpush3.bf16.msra.mxu0 %v3670_v61  ;;  %v3678_v3 = vpack.c.bf16 %v2494_v43, %v2493_v56 }
 0x335   : > { %3675 = vmatprep.subr.bf16.mxu0 %v3674_v22  ;;  %3693 = vmatpush3.bf16.msra.mxu1 %v3690_v51  ;;  %v2760_v38 = vadd.f32 %v2738_v58, %v4362_v33 }
 0x336   : > { %3695 = vmatprep.subr.bf16.mxu1 %v3694_v62 }
 0x337   : > { %v2772_v50 = vmax.f32 %v2760_v38, 0.0 }
 0x338   : > { %v2742_v16 = vpop.permute.xlu1 %2741  ;;  %3677 = vmatpush3.bf16.msra.mxu0 %v3674_v22 }
 0x339   : > { %v2761_v54 = vadd.f32 %v2742_v16, %v4368_v26  ;;  %3679 = vmatprep.subr.bf16.mxu0 %v3678_v3  ;;  %3697 = vmatpush3.bf16.msra.mxu1 %v3694_v62 }
 0x33a   : > { %3699 = vmatprep.subr.bf16.mxu1 %v3698_v34 }
 0x33b   : > { %v2773_v53 = vmax.f32 %v2761_v54, 0.0 }
 0x33c   : > { %3681 = vmatpush3.bf16.msra.mxu0 %v3678_v3 }
 0x33d   : > { %v3702_v25 = vpack.c.bf16 %v2773_v53, %v2772_v50  ;;  %v2471_v39 = vpop.permute.xlu1 %2470  ;;  %3701 = vmatpush3.bf16.msra.mxu1 %v3698_v34 }
 0x33e   : > { %v2484_v33 = vadd.f32 %v2471_v39, %v4399_v8 }
 0x33f   : > { %3703 = vmatprep.subr.bf16.mxu1 %v3702_v25 }
 0x340   : > { %v2496_v19 = vmax.f32 %v2484_v33, 0.0 }
 0x341   : > { %3705 = vmatpush3.bf16.msra.mxu1 %v3702_v25 }
 0x342   : > { %v3682_v26 = vpack.c.bf16 %v2496_v19, %v2495_v28  ;;  %v2750_v30 = vpop.permute.xlu1 %2749 }
 0x343   : > { %v2763_v48 = vadd.f32 %v2750_v30, %v4399_v8  ;;  %v4573_v8 = vpop.permute.xlu0 %812 }
 0x344   : > { %3683 = vmatprep.subr.bf16.mxu0 %v3682_v26 }
 0x345   : > { %v2775_v5 = vmax.f32 %v2763_v48, 0.0  ;;  %3685 = vmatpush3.bf16.msra.mxu0 %v3682_v26 }
 0x347   : > { %v3706_v45 = vpack.c.bf16 %v2775_v5, %v2774_v44  ;;  %v4575_v12 = vpop.permute.xlu1 %807 }
 0x348   : > { %3475 = vmatmul.mubr.msk.f32.vlgmr.msra.gmra.mrb[18].mxu0 %vm815_vm3, %v4423_v36 }
 0x349   : > { %3707 = vmatprep.subr.bf16.mxu1 %v3706_v45 }
 0x34a   : > { %3709 = vmatpush3.bf16.msra.mxu1 %v3706_v45 }
 0x34d   : > { %3502 = vmatmul.mubr.msk.f32.vlgmr.msra.gmra.mrb[8].mxu1 %vm815_vm3, %v4423_v36 }
 0x3c4   : > { %v3314_v40 = vpop.f32.mrb[12].mxu0 }
 0x3c5   : > { %v894_v4 = vadd.f32 %v3314_v40, %v4573_v8  ;;  %v888_v55 = vpop.f32.mrb[13].mxu0 }
 0x3c6   : > { %v889_v9 = vadd.f32 %v888_v55, %v4575_v12 }
 0x3c7   : > { %v948_v46 = vcombine.high %v894_v4, %v894_v4  ;;  %v955_v36 = vrot.slane %v894_v4, %v4577_v10 }
 0x3c8   : > { %v899_v37 = vcombine.high %v889_v9, %v889_v9  ;;  %v906_v29 = vrot.slane %v889_v9, %v4577_v10 }
 0x3c9   : > { %v3341_v63 = vpop.f32.mrb[2].mxu1  ;;  %v962_v31 = vrot.slane %v948_v46, %v4577_v10  ;;  %v963_v21 = vcombine.high %v955_v36, %v955_v36  ;;  %v971_v23 = vrot.slane %v955_v36, %v4577_v10 }
 0x3ca   : > { %v1174_v24 = vadd.f32 %v3341_v63, %v4573_v8  ;;  %v913_v60 = vrot.slane %v899_v37, %v4577_v10  ;;  %v914_v0 = vcombine.high %v906_v29, %v906_v29  ;;  %v922_v18 = vrot.slane %v906_v29, %v4577_v10  ;;  %v1168_v61 = vpop.f32.mrb[3].mxu1 }
 0x3cb   : > { %v964_v59 = vcombine.high %v962_v31, %v962_v31  ;;  %v978_v17 = vrot.slane %v962_v31, %v4577_v10  ;;  %v985_v51 = vrot.slane %v963_v21, %v4577_v10  ;;  %v993_v27 = vcombine.high %v971_v23, %v971_v23  ;;  %1022 = vst.msk [vmem:[%s4586_s23 + $0x40] sm:$0x1] %vm1013_vm4, %v971_v23 }
 0x3cc   : > { %v1228_v57 = vcombine.high %v1174_v24, %v1174_v24  ;;  %v1235_v6 = vrot.slane %v1174_v24, %v4577_v10  ;;  %v915_v14 = vcombine.high %v913_v60, %v913_v60  ;;  %v929_v49 = vrot.slane %v913_v60, %v4577_v10  ;;  %1014 = vst.msk [vmem:[%s4586_s23] sm:$0x1] %vm1013_vm4, %v922_v18 }
 0x3cd   : > { %v992_v15 = vrot.slane %v964_v59, %v4577_v10  ;;  %v994_v52 = vcombine.high %v978_v17, %v978_v17  ;;  %v995_v22 = vcombine.high %v985_v51, %v985_v51  ;;  %1023 = vst.msk [vmem:[%s4586_s23 + $0x48] sm:$0x1] %vm1013_vm4, %v985_v51  ;;  %1024 = vst.msk [vmem:[%s4586_s23 + $0x50] sm:$0x1] %vm1013_vm4, %v993_v27 }
 0x3ce   : > { %1026 = vst.msk [vmem:[%s4586_s23 + $0x60] sm:$0x1] %vm1013_vm4, %v978_v17  ;;  %v936_v56 = vrot.slane %v914_v0, %v4577_v10  ;;  %v1242_v62 = vrot.slane %v1228_v57, %v4577_v10  ;;  %v1243_v41 = vcombine.high %v1235_v6, %v1235_v6  ;;  %v1251_v58 = vrot.slane %v1235_v6, %v4577_v10 }
 0x3cf   : > { %v943_v43 = vrot.slane %v915_v14, %v4577_v10  ;;  %1018 = vst.msk [vmem:[%s4586_s23 + $0x20] sm:$0x1] %vm1013_vm4, %v929_v49  ;;  %v996_v20 = vcombine.high %v992_v15, %v992_v15  ;;  %1025 = vst.msk [vmem:[%s4586_s23 + $0x58] sm:$0x1] %vm1013_vm4, %v995_v22  ;;  %v944_v3 = vcombine.high %v922_v18, %v922_v18 }
 0x3d0   : > { %1027 = vst.msk [vmem:[%s4586_s23 + $0x68] sm:$0x1] %vm1013_vm4, %v992_v15  ;;  %1028 = vst.msk [vmem:[%s4586_s23 + $0x70] sm:$0x1] %vm1013_vm4, %v994_v52  ;;  %v945_v38 = vcombine.high %v929_v49, %v929_v49  ;;  %v946_v47 = vcombine.high %v936_v56, %v936_v56  ;;  %v1244_v34 = vcombine.high %v1242_v62, %v1242_v62 }
 0x3d1   : > { %1015 = vst.msk [vmem:[%s4586_s23 + $0x8] sm:$0x1] %vm1013_vm4, %v936_v56  ;;  %v1258_v16 = vrot.slane %v1242_v62, %v4577_v10  ;;  %v1265_v54 = vrot.slane %v1243_v41, %v4577_v10  ;;  %v1273_v50 = vcombine.high %v1251_v58, %v1251_v58  ;;  %1301 = vst.msk [vmem:[%s4586_s23 + $0x41] sm:$0x1] %vm1013_vm4, %v1251_v58 }
 0x3d2   : > { %1019 = vst.msk [vmem:[%s4586_s23 + $0x28] sm:$0x1] %vm1013_vm4, %v943_v43  ;;  %1029 = vst.msk [vmem:[%s4586_s23 + $0x78] sm:$0x1] %vm1013_vm4, %v996_v20  ;;  %v947_v53 = vcombine.high %v943_v43, %v943_v43  ;;  %v1169_v13 = vadd.f32 %v1168_v61, %v4575_v12  ;;  %v1272_v25 = vrot.slane %v1244_v34, %v4577_v10 }
 0x3d3   : > { %1016 = vst.msk [vmem:[%s4586_s23 + $0x10] sm:$0x1] %vm1013_vm4, %v944_v3  ;;  %1017 = vst.msk [vmem:[%s4586_s23 + $0x18] sm:$0x1] %vm1013_vm4, %v946_v47  ;;  %v1274_v39 = vcombine.high %v1258_v16, %v1258_v16  ;;  %v1275_v1 = vcombine.high %v1265_v54, %v1265_v54 }
 0x3d4   : > { %1020 = vst.msk [vmem:[%s4586_s23 + $0x30] sm:$0x1] %vm1013_vm4, %v945_v38  ;;  %1302 = vst.msk [vmem:[%s4586_s23 + $0x49] sm:$0x1] %vm1013_vm4, %v1265_v54  ;;  %v1179_v33 = vcombine.high %v1169_v13, %v1169_v13  ;;  %v1186_v28 = vrot.slane %v1169_v13, %v4577_v10  ;;  %v1276_v19 = vcombine.high %v1272_v25, %v1272_v25 }
 0x3d5   : > { %1303 = vst.msk [vmem:[%s4586_s23 + $0x51] sm:$0x1] %vm1013_vm4, %v1273_v50  ;;  %1305 = vst.msk [vmem:[%s4586_s23 + $0x61] sm:$0x1] %vm1013_vm4, %v1258_v16 }
 0x3d6   : > { %1021 = vst.msk [vmem:[%s4586_s23 + $0x38] sm:$0x1] %vm1013_vm4, %v947_v53  ;;  %1304 = vst.msk [vmem:[%s4586_s23 + $0x59] sm:$0x1] %vm1013_vm4, %v1275_v1  ;;  %v1193_v2 = vrot.slane %v1179_v33, %v4577_v10  ;;  %v1194_v26 = vcombine.high %v1186_v28, %v1186_v28  ;;  %v1202_v30 = vrot.slane %v1186_v28, %v4577_v10 }
 0x3d7   : > { %1306 = vst.msk [vmem:[%s4586_s23 + $0x69] sm:$0x1] %vm1013_vm4, %v1272_v25  ;;  %1307 = vst.msk [vmem:[%s4586_s23 + $0x71] sm:$0x1] %vm1013_vm4, %v1274_v39 }
 0x3d8   : > { %1308 = vst.msk [vmem:[%s4586_s23 + $0x79] sm:$0x1] %vm1013_vm4, %v1276_v19  ;;  %v1195_v48 = vcombine.high %v1193_v2, %v1193_v2  ;;  %v1209_v44 = vrot.slane %v1193_v2, %v4577_v10  ;;  %v1216_v5 = vrot.slane %v1194_v26, %v4577_v10  ;;  %v1224_v45 = vcombine.high %v1202_v30, %v1202_v30 }
 0x3d9   : > { %1293 = vst.msk [vmem:[%s4586_s23 + $0x1] sm:$0x1] %vm1013_vm4, %v1202_v30 }
 0x3da   : > { %v1223_v32 = vrot.slane %v1195_v48, %v4577_v10  ;;  %v1225_v42 = vcombine.high %v1209_v44, %v1209_v44  ;;  %v1226_v11 = vcombine.high %v1216_v5, %v1216_v5  ;;  %1294 = vst.msk [vmem:[%s4586_s23 + $0x9] sm:$0x1] %vm1013_vm4, %v1216_v5  ;;  %1295 = vst.msk [vmem:[%s4586_s23 + $0x11] sm:$0x1] %vm1013_vm4, %v1224_v45 }
 0x3db   : > { %1297 = vst.msk [vmem:[%s4586_s23 + $0x21] sm:$0x1] %vm1013_vm4, %v1209_v44 }
 0x3dc   : > { %v1227_v35 = vcombine.high %v1223_v32, %v1223_v32  ;;  %1296 = vst.msk [vmem:[%s4586_s23 + $0x19] sm:$0x1] %vm1013_vm4, %v1226_v11  ;;  %1298 = vst.msk [vmem:[%s4586_s23 + $0x29] sm:$0x1] %vm1013_vm4, %v1223_v32 }
 0x3dd   : > { %1299 = vst.msk [vmem:[%s4586_s23 + $0x31] sm:$0x1] %vm1013_vm4, %v1225_v42 }
 0x3de   : > { %1300 = vst.msk [vmem:[%s4586_s23 + $0x39] sm:$0x1] %vm1013_vm4, %v1227_v35 }
 0x3e1   : > { %v3368_v7 = vpop.f32.mrb[14].mxu0 }
 0x3e2   : > { %v1453_v40 = vadd.f32 %v3368_v7, %v4573_v8  ;;  %v1447_v4 = vpop.f32.mrb[15].mxu0 }
 0x3e3   : > { %v1448_v55 = vadd.f32 %v1447_v4, %v4575_v12 }
 0x3e4   : > { %v1507_v9 = vcombine.high %v1453_v40, %v1453_v40  ;;  %v1514_v46 = vrot.slane %v1453_v40, %v4577_v10 }
 0x3e5   : > { %v1458_v36 = vcombine.high %v1448_v55, %v1448_v55  ;;  %v1465_v37 = vrot.slane %v1448_v55, %v4577_v10 }
 0x3e6   : > { %v1521_v29 = vrot.slane %v1507_v9, %v4577_v10  ;;  %v1522_v63 = vcombine.high %v1514_v46, %v1514_v46  ;;  %v1530_v31 = vrot.slane %v1514_v46, %v4577_v10  ;;  %v3395_v21 = vpop.f32.mrb[4].mxu1 }
 0x3e7   : > { %v1732_v23 = vadd.f32 %v3395_v21, %v4573_v8  ;;  %v1472_v24 = vrot.slane %v1458_v36, %v4577_v10  ;;  %v1473_v60 = vcombine.high %v1465_v37, %v1465_v37  ;;  %v1481_v0 = vrot.slane %v1465_v37, %v4577_v10  ;;  %v1726_v18 = vpop.f32.mrb[5].mxu1 }
 0x3e8   : > { %v1523_v61 = vcombine.high %v1521_v29, %v1521_v29  ;;  %v1537_v59 = vrot.slane %v1521_v29, %v4577_v10  ;;  %v1544_v17 = vrot.slane %v1522_v63, %v4577_v10  ;;  %v1552_v51 = vcombine.high %v1530_v31, %v1530_v31  ;;  %1580 = vst.msk [vmem:[%s4586_s23 + $0x42] sm:$0x1] %vm1013_vm4, %v1530_v31 }
 0x3e9   : > { %v1786_v27 = vcombine.high %v1732_v23, %v1732_v23  ;;  %v1793_v57 = vrot.slane %v1732_v23, %v4577_v10  ;;  %v1474_v6 = vcombine.high %v1472_v24, %v1472_v24  ;;  %v1488_v14 = vrot.slane %v1472_v24, %v4577_v10  ;;  %1572 = vst.msk [vmem:[%s4586_s23 + $0x2] sm:$0x1] %vm1013_vm4, %v1481_v0 }
 0x3ea   : > { %v1551_v49 = vrot.slane %v1523_v61, %v4577_v10  ;;  %v1553_v15 = vcombine.high %v1537_v59, %v1537_v59  ;;  %v1554_v52 = vcombine.high %v1544_v17, %v1544_v17  ;;  %1581 = vst.msk [vmem:[%s4586_s23 + $0x4a] sm:$0x1] %vm1013_vm4, %v1544_v17  ;;  %1582 = vst.msk [vmem:[%s4586_s23 + $0x52] sm:$0x1] %vm1013_vm4, %v1552_v51 }
 0x3eb   : > { %1584 = vst.msk [vmem:[%s4586_s23 + $0x62] sm:$0x1] %vm1013_vm4, %v1537_v59  ;;  %v1495_v22 = vrot.slane %v1473_v60, %v4577_v10  ;;  %v1800_v56 = vrot.slane %v1786_v27, %v4577_v10  ;;  %v1801_v62 = vcombine.high %v1793_v57, %v1793_v57  ;;  %v1809_v41 = vrot.slane %v1793_v57, %v4577_v10 }
 0x3ec   : > { %v1502_v58 = vrot.slane %v1474_v6, %v4577_v10  ;;  %1576 = vst.msk [vmem:[%s4586_s23 + $0x22] sm:$0x1] %vm1013_vm4, %v1488_v14  ;;  %v1555_v43 = vcombine.high %v1551_v49, %v1551_v49  ;;  %1583 = vst.msk [vmem:[%s4586_s23 + $0x5a] sm:$0x1] %vm1013_vm4, %v1554_v52  ;;  %v1503_v20 = vcombine.high %v1481_v0, %v1481_v0 }
 0x3ed   : > { %1585 = vst.msk [vmem:[%s4586_s23 + $0x6a] sm:$0x1] %vm1013_vm4, %v1551_v49  ;;  %1586 = vst.msk [vmem:[%s4586_s23 + $0x72] sm:$0x1] %vm1013_vm4, %v1553_v15  ;;  %v1504_v3 = vcombine.high %v1488_v14, %v1488_v14  ;;  %v1505_v38 = vcombine.high %v1495_v22, %v1495_v22  ;;  %v1802_v47 = vcombine.high %v1800_v56, %v1800_v56 }
 0x3ee   : > { %1573 = vst.msk [vmem:[%s4586_s23 + $0xa] sm:$0x1] %vm1013_vm4, %v1495_v22  ;;  %v1816_v34 = vrot.slane %v1800_v56, %v4577_v10  ;;  %v1823_v16 = vrot.slane %v1801_v62, %v4577_v10  ;;  %v1831_v54 = vcombine.high %v1809_v41, %v1809_v41  ;;  %1859 = vst.msk [vmem:[%s4586_s23 + $0x43] sm:$0x1] %vm1013_vm4, %v1809_v41 }
 0x3ef   : > { %1577 = vst.msk [vmem:[%s4586_s23 + $0x2a] sm:$0x1] %vm1013_vm4, %v1502_v58  ;;  %1587 = vst.msk [vmem:[%s4586_s23 + $0x7a] sm:$0x1] %vm1013_vm4, %v1555_v43  ;;  %v1506_v50 = vcombine.high %v1502_v58, %v1502_v58  ;;  %v1727_v53 = vadd.f32 %v1726_v18, %v4575_v12  ;;  %v1830_v13 = vrot.slane %v1802_v47, %v4577_v10 }
 0x3f0   : > { %1574 = vst.msk [vmem:[%s4586_s23 + $0x12] sm:$0x1] %vm1013_vm4, %v1503_v20  ;;  %1575 = vst.msk [vmem:[%s4586_s23 + $0x1a] sm:$0x1] %vm1013_vm4, %v1505_v38  ;;  %v1832_v25 = vcombine.high %v1816_v34, %v1816_v34  ;;  %v1833_v39 = vcombine.high %v1823_v16, %v1823_v16 }
 0x3f1   : > { %1578 = vst.msk [vmem:[%s4586_s23 + $0x32] sm:$0x1] %vm1013_vm4, %v1504_v3  ;;  %1860 = vst.msk [vmem:[%s4586_s23 + $0x4b] sm:$0x1] %vm1013_vm4, %v1823_v16  ;;  %v1737_v1 = vcombine.high %v1727_v53, %v1727_v53  ;;  %v1744_v33 = vrot.slane %v1727_v53, %v4577_v10  ;;  %v1834_v28 = vcombine.high %v1830_v13, %v1830_v13 }
 0x3f2   : > { %1861 = vst.msk [vmem:[%s4586_s23 + $0x53] sm:$0x1] %vm1013_vm4, %v1831_v54  ;;  %1863 = vst.msk [vmem:[%s4586_s23 + $0x63] sm:$0x1] %vm1013_vm4, %v1816_v34 }
 0x3f3   : > { %1579 = vst.msk [vmem:[%s4586_s23 + $0x3a] sm:$0x1] %vm1013_vm4, %v1506_v50  ;;  %1862 = vst.msk [vmem:[%s4586_s23 + $0x5b] sm:$0x1] %vm1013_vm4, %v1833_v39  ;;  %v1751_v19 = vrot.slane %v1737_v1, %v4577_v10  ;;  %v1752_v2 = vcombine.high %v1744_v33, %v1744_v33  ;;  %v1760_v26 = vrot.slane %v1744_v33, %v4577_v10 }
 0x3f4   : > { %1864 = vst.msk [vmem:[%s4586_s23 + $0x6b] sm:$0x1] %vm1013_vm4, %v1830_v13  ;;  %1865 = vst.msk [vmem:[%s4586_s23 + $0x73] sm:$0x1] %vm1013_vm4, %v1832_v25 }
 0x3f5   : > { %1866 = vst.msk [vmem:[%s4586_s23 + $0x7b] sm:$0x1] %vm1013_vm4, %v1834_v28  ;;  %v1753_v30 = vcombine.high %v1751_v19, %v1751_v19  ;;  %v1767_v48 = vrot.slane %v1751_v19, %v4577_v10  ;;  %v1774_v44 = vrot.slane %v1752_v2, %v4577_v10  ;;  %v1782_v5 = vcombine.high %v1760_v26, %v1760_v26 }
 0x3f6   : > { %1851 = vst.msk [vmem:[%s4586_s23 + $0x3] sm:$0x1] %vm1013_vm4, %v1760_v26 }
 0x3f7   : > { %v1781_v45 = vrot.slane %v1753_v30, %v4577_v10  ;;  %v1783_v32 = vcombine.high %v1767_v48, %v1767_v48  ;;  %v1784_v42 = vcombine.high %v1774_v44, %v1774_v44  ;;  %1852 = vst.msk [vmem:[%s4586_s23 + $0xb] sm:$0x1] %vm1013_vm4, %v1774_v44  ;;  %1853 = vst.msk [vmem:[%s4586_s23 + $0x13] sm:$0x1] %vm1013_vm4, %v1782_v5 }
 0x3f8   : > { %1855 = vst.msk [vmem:[%s4586_s23 + $0x23] sm:$0x1] %vm1013_vm4, %v1767_v48 }
 0x3f9   : > { %v1785_v11 = vcombine.high %v1781_v45, %v1781_v45  ;;  %1854 = vst.msk [vmem:[%s4586_s23 + $0x1b] sm:$0x1] %vm1013_vm4, %v1784_v42  ;;  %1856 = vst.msk [vmem:[%s4586_s23 + $0x2b] sm:$0x1] %vm1013_vm4, %v1781_v45 }
 0x3fa   : > { %1857 = vst.msk [vmem:[%s4586_s23 + $0x33] sm:$0x1] %vm1013_vm4, %v1783_v32 }
 0x3fb   : > { %1858 = vst.msk [vmem:[%s4586_s23 + $0x3b] sm:$0x1] %vm1013_vm4, %v1785_v11 }
 0x3fe   : > { %v3422_v35 = vpop.f32.mrb[16].mxu0 }
 0x3ff   : > { %v2011_v7 = vadd.f32 %v3422_v35, %v4573_v8  ;;  %v2005_v40 = vpop.f32.mrb[17].mxu0 }
 0x400   : > { %v2006_v4 = vadd.f32 %v2005_v40, %v4575_v12 }
 0x401   : > { %v2065_v55 = vcombine.high %v2011_v7, %v2011_v7  ;;  %v2072_v9 = vrot.slane %v2011_v7, %v4577_v10 }
 0x402   : > { %v2016_v46 = vcombine.high %v2006_v4, %v2006_v4  ;;  %v2023_v36 = vrot.slane %v2006_v4, %v4577_v10 }
 0x403   : > { %v2079_v37 = vrot.slane %v2065_v55, %v4577_v10  ;;  %v2080_v29 = vcombine.high %v2072_v9, %v2072_v9  ;;  %v2088_v63 = vrot.slane %v2072_v9, %v4577_v10  ;;  %v3449_v31 = vpop.f32.mrb[6].mxu1 }
 0x404   : > { %v2290_v21 = vadd.f32 %v3449_v31, %v4573_v8  ;;  %v2030_v23 = vrot.slane %v2016_v46, %v4577_v10  ;;  %v2031_v24 = vcombine.high %v2023_v36, %v2023_v36  ;;  %v2039_v60 = vrot.slane %v2023_v36, %v4577_v10  ;;  %v2284_v0 = vpop.f32.mrb[7].mxu1 }
 0x405   : > { %v2081_v18 = vcombine.high %v2079_v37, %v2079_v37  ;;  %v2095_v61 = vrot.slane %v2079_v37, %v4577_v10  ;;  %v2102_v59 = vrot.slane %v2080_v29, %v4577_v10  ;;  %v2110_v17 = vcombine.high %v2088_v63, %v2088_v63  ;;  %2138 = vst.msk [vmem:[%s4586_s23 + $0x44] sm:$0x1] %vm1013_vm4, %v2088_v63 }
 0x406   : > { %v2344_v51 = vcombine.high %v2290_v21, %v2290_v21  ;;  %v2351_v27 = vrot.slane %v2290_v21, %v4577_v10  ;;  %v2032_v57 = vcombine.high %v2030_v23, %v2030_v23  ;;  %v2046_v6 = vrot.slane %v2030_v23, %v4577_v10  ;;  %2130 = vst.msk [vmem:[%s4586_s23 + $0x4] sm:$0x1] %vm1013_vm4, %v2039_v60 }
 0x407   : > { %v2109_v14 = vrot.slane %v2081_v18, %v4577_v10  ;;  %v2111_v49 = vcombine.high %v2095_v61, %v2095_v61  ;;  %v2112_v15 = vcombine.high %v2102_v59, %v2102_v59  ;;  %2139 = vst.msk [vmem:[%s4586_s23 + $0x4c] sm:$0x1] %vm1013_vm4, %v2102_v59  ;;  %2140 = vst.msk [vmem:[%s4586_s23 + $0x54] sm:$0x1] %vm1013_vm4, %v2110_v17 }
 0x408   : > { %2142 = vst.msk [vmem:[%s4586_s23 + $0x64] sm:$0x1] %vm1013_vm4, %v2095_v61  ;;  %v2053_v52 = vrot.slane %v2031_v24, %v4577_v10  ;;  %v2358_v22 = vrot.slane %v2344_v51, %v4577_v10  ;;  %v2359_v56 = vcombine.high %v2351_v27, %v2351_v27  ;;  %v2367_v62 = vrot.slane %v2351_v27, %v4577_v10 }
 0x409   : > { %v2060_v41 = vrot.slane %v2032_v57, %v4577_v10  ;;  %2134 = vst.msk [vmem:[%s4586_s23 + $0x24] sm:$0x1] %vm1013_vm4, %v2046_v6  ;;  %v2113_v58 = vcombine.high %v2109_v14, %v2109_v14  ;;  %2141 = vst.msk [vmem:[%s4586_s23 + $0x5c] sm:$0x1] %vm1013_vm4, %v2112_v15  ;;  %v2061_v43 = vcombine.high %v2039_v60, %v2039_v60 }
 0x40a   : > { %2143 = vst.msk [vmem:[%s4586_s23 + $0x6c] sm:$0x1] %vm1013_vm4, %v2109_v14  ;;  %2144 = vst.msk [vmem:[%s4586_s23 + $0x74] sm:$0x1] %vm1013_vm4, %v2111_v49  ;;  %v2062_v20 = vcombine.high %v2046_v6, %v2046_v6  ;;  %v2063_v3 = vcombine.high %v2053_v52, %v2053_v52  ;;  %v2360_v38 = vcombine.high %v2358_v22, %v2358_v22 }
 0x40b   : > { %2131 = vst.msk [vmem:[%s4586_s23 + $0xc] sm:$0x1] %vm1013_vm4, %v2053_v52  ;;  %v2374_v47 = vrot.slane %v2358_v22, %v4577_v10  ;;  %v2381_v34 = vrot.slane %v2359_v56, %v4577_v10  ;;  %v2389_v16 = vcombine.high %v2367_v62, %v2367_v62  ;;  %2417 = vst.msk [vmem:[%s4586_s23 + $0x45] sm:$0x1] %vm1013_vm4, %v2367_v62 }
 0x40c   : > { %2135 = vst.msk [vmem:[%s4586_s23 + $0x2c] sm:$0x1] %vm1013_vm4, %v2060_v41  ;;  %2145 = vst.msk [vmem:[%s4586_s23 + $0x7c] sm:$0x1] %vm1013_vm4, %v2113_v58  ;;  %v2064_v54 = vcombine.high %v2060_v41, %v2060_v41  ;;  %v2285_v50 = vadd.f32 %v2284_v0, %v4575_v12  ;;  %v2388_v53 = vrot.slane %v2360_v38, %v4577_v10 }
 0x40d   : > { %2132 = vst.msk [vmem:[%s4586_s23 + $0x14] sm:$0x1] %vm1013_vm4, %v2061_v43  ;;  %2133 = vst.msk [vmem:[%s4586_s23 + $0x1c] sm:$0x1] %vm1013_vm4, %v2063_v3  ;;  %v2390_v13 = vcombine.high %v2374_v47, %v2374_v47  ;;  %v2391_v25 = vcombine.high %v2381_v34, %v2381_v34 }
 0x40e   : > { %2136 = vst.msk [vmem:[%s4586_s23 + $0x34] sm:$0x1] %vm1013_vm4, %v2062_v20  ;;  %2418 = vst.msk [vmem:[%s4586_s23 + $0x4d] sm:$0x1] %vm1013_vm4, %v2381_v34  ;;  %v2295_v39 = vcombine.high %v2285_v50, %v2285_v50  ;;  %v2302_v1 = vrot.slane %v2285_v50, %v4577_v10  ;;  %v2392_v33 = vcombine.high %v2388_v53, %v2388_v53 }
 0x40f   : > { %2419 = vst.msk [vmem:[%s4586_s23 + $0x55] sm:$0x1] %vm1013_vm4, %v2389_v16  ;;  %2421 = vst.msk [vmem:[%s4586_s23 + $0x65] sm:$0x1] %vm1013_vm4, %v2374_v47 }
 0x410   : > { %2137 = vst.msk [vmem:[%s4586_s23 + $0x3c] sm:$0x1] %vm1013_vm4, %v2064_v54  ;;  %2420 = vst.msk [vmem:[%s4586_s23 + $0x5d] sm:$0x1] %vm1013_vm4, %v2391_v25  ;;  %v2309_v28 = vrot.slane %v2295_v39, %v4577_v10  ;;  %v2310_v19 = vcombine.high %v2302_v1, %v2302_v1  ;;  %v2318_v2 = vrot.slane %v2302_v1, %v4577_v10 }
 0x411   : > { %2422 = vst.msk [vmem:[%s4586_s23 + $0x6d] sm:$0x1] %vm1013_vm4, %v2388_v53  ;;  %2423 = vst.msk [vmem:[%s4586_s23 + $0x75] sm:$0x1] %vm1013_vm4, %v2390_v13 }
 0x412   : > { %2424 = vst.msk [vmem:[%s4586_s23 + $0x7d] sm:$0x1] %vm1013_vm4, %v2392_v33  ;;  %v2311_v26 = vcombine.high %v2309_v28, %v2309_v28  ;;  %v2325_v30 = vrot.slane %v2309_v28, %v4577_v10  ;;  %v2332_v48 = vrot.slane %v2310_v19, %v4577_v10  ;;  %v2340_v44 = vcombine.high %v2318_v2, %v2318_v2 }
 0x413   : > { %2409 = vst.msk [vmem:[%s4586_s23 + $0x5] sm:$0x1] %vm1013_vm4, %v2318_v2 }
 0x414   : > { %v2339_v5 = vrot.slane %v2311_v26, %v4577_v10  ;;  %v2341_v45 = vcombine.high %v2325_v30, %v2325_v30  ;;  %v2342_v32 = vcombine.high %v2332_v48, %v2332_v48  ;;  %2410 = vst.msk [vmem:[%s4586_s23 + $0xd] sm:$0x1] %vm1013_vm4, %v2332_v48  ;;  %2411 = vst.msk [vmem:[%s4586_s23 + $0x15] sm:$0x1] %vm1013_vm4, %v2340_v44 }
 0x415   : > { %2413 = vst.msk [vmem:[%s4586_s23 + $0x25] sm:$0x1] %vm1013_vm4, %v2325_v30 }
 0x416   : > { %v2343_v42 = vcombine.high %v2339_v5, %v2339_v5  ;;  %2412 = vst.msk [vmem:[%s4586_s23 + $0x1d] sm:$0x1] %vm1013_vm4, %v2342_v32  ;;  %2414 = vst.msk [vmem:[%s4586_s23 + $0x2d] sm:$0x1] %vm1013_vm4, %v2339_v5 }
 0x417   : > { %2415 = vst.msk [vmem:[%s4586_s23 + $0x35] sm:$0x1] %vm1013_vm4, %v2341_v45 }
 0x418   : > { %2416 = vst.msk [vmem:[%s4586_s23 + $0x3d] sm:$0x1] %vm1013_vm4, %v2343_v42 }
 0x41b   : > { %v3476_v11 = vpop.f32.mrb[18].mxu0 }
 0x41c   : > { %v2569_v35 = vadd.f32 %v3476_v11, %v4573_v8  ;;  %v2563_v7 = vpop.f32.mrb[19].mxu0 }
 0x41d   : > { %v2564_v40 = vadd.f32 %v2563_v7, %v4575_v12 }
 0x41e   : > { %v2623_v4 = vcombine.high %v2569_v35, %v2569_v35  ;;  %v2630_v55 = vrot.slane %v2569_v35, %v4577_v10 }
 0x41f   : > { %v2574_v9 = vcombine.high %v2564_v40, %v2564_v40  ;;  %v2581_v46 = vrot.slane %v2564_v40, %v4577_v10 }
 0x420   : > { %v2637_v36 = vrot.slane %v2623_v4, %v4577_v10  ;;  %v2638_v37 = vcombine.high %v2630_v55, %v2630_v55  ;;  %v2646_v29 = vrot.slane %v2630_v55, %v4577_v10  ;;  %v3503_v63 = vpop.f32.mrb[8].mxu1 }
 0x421   : > { %v2588_v31 = vrot.slane %v2574_v9, %v4577_v10  ;;  %v2589_v21 = vcombine.high %v2581_v46, %v2581_v46  ;;  %v2597_v23 = vrot.slane %v2581_v46, %v4577_v10  ;;  %v2848_v24 = vadd.f32 %v3503_v63, %v4573_v8  ;;  %v2842_v60 = vpop.f32.mrb[9].mxu1 }
 0x422   : > { %v2639_v0 = vcombine.high %v2637_v36, %v2637_v36  ;;  %v2653_v18 = vrot.slane %v2637_v36, %v4577_v10  ;;  %v2660_v61 = vrot.slane %v2638_v37, %v4577_v10  ;;  %v2668_v59 = vcombine.high %v2646_v29, %v2646_v29  ;;  %2696 = vst.msk [vmem:[%s4586_s23 + $0x46] sm:$0x1] %vm1013_vm4, %v2646_v29 }
 0x423   : > { %v2590_v17 = vcombine.high %v2588_v31, %v2588_v31  ;;  %v2604_v51 = vrot.slane %v2588_v31, %v4577_v10  ;;  %v2611_v27 = vrot.slane %v2589_v21, %v4577_v10  ;;  %v2619_v8 = vcombine.high %v2597_v23, %v2597_v23  ;;  %2688 = vst.msk [vmem:[%s4586_s23 + $0x6] sm:$0x1] %vm1013_vm4, %v2597_v23 }
 0x424   : > { %v2667_v57 = vrot.slane %v2639_v0, %v4577_v10  ;;  %v2669_v6 = vcombine.high %v2653_v18, %v2653_v18  ;;  %v2670_v14 = vcombine.high %v2660_v61, %v2660_v61  ;;  %2697 = vst.msk [vmem:[%s4586_s23 + $0x4e] sm:$0x1] %vm1013_vm4, %v2660_v61  ;;  %2698 = vst.msk [vmem:[%s4586_s23 + $0x56] sm:$0x1] %vm1013_vm4, %v2668_v59 }
 0x425   : > { %2700 = vst.msk [vmem:[%s4586_s23 + $0x66] sm:$0x1] %vm1013_vm4, %v2653_v18  ;;  %v2902_v49 = vcombine.high %v2848_v24, %v2848_v24  ;;  %v2618_v15 = vrot.slane %v2590_v17, %v4577_v10  ;;  %v2620_v52 = vcombine.high %v2604_v51, %v2604_v51  ;;  %v2621_v22 = vcombine.high %v2611_v27, %v2611_v27 }
 0x426   : > { %2689 = vst.msk [vmem:[%s4586_s23 + $0xe] sm:$0x1] %vm1013_vm4, %v2611_v27  ;;  %2690 = vst.msk [vmem:[%s4586_s23 + $0x16] sm:$0x1] %vm1013_vm4, %v2619_v8  ;;  %v2909_v56 = vrot.slane %v2848_v24, %v4577_v10  ;;  %v2671_v62 = vcombine.high %v2667_v57, %v2667_v57  ;;  %v2843_v58 = vadd.f32 %v2842_v60, %v4575_v12 }
 0x427   : > { %2692 = vst.msk [vmem:[%s4586_s23 + $0x26] sm:$0x1] %vm1013_vm4, %v2604_v51  ;;  %2699 = vst.msk [vmem:[%s4586_s23 + $0x5e] sm:$0x1] %vm1013_vm4, %v2670_v14  ;;  %v2916_v41 = vrot.slane %v2902_v49, %v4577_v10  ;;  %v2622_v43 = vcombine.high %v2618_v15, %v2618_v15 }
 0x428   : > { %2701 = vst.msk [vmem:[%s4586_s23 + $0x6e] sm:$0x1] %vm1013_vm4, %v2667_v57  ;;  %2702 = vst.msk [vmem:[%s4586_s23 + $0x76] sm:$0x1] %vm1013_vm4, %v2669_v6  ;;  %v2917_v20 = vcombine.high %v2909_v56, %v2909_v56  ;;  %v2925_v3 = vrot.slane %v2909_v56, %v4577_v10  ;;  %v2853_v34 = vcombine.high %v2843_v58, %v2843_v58 }
 0x429   : > { %2691 = vst.msk [vmem:[%s4586_s23 + $0x1e] sm:$0x1] %vm1013_vm4, %v2621_v22  ;;  %2693 = vst.msk [vmem:[%s4586_s23 + $0x2e] sm:$0x1] %vm1013_vm4, %v2618_v15  ;;  %v2918_v38 = vcombine.high %v2916_v41, %v2916_v41  ;;  %v2932_v47 = vrot.slane %v2916_v41, %v4577_v10  ;;  %v2860_v12 = vrot.slane %v2843_v58, %v4577_v10 }
 0x42a   : > { %2694 = vst.msk [vmem:[%s4586_s23 + $0x36] sm:$0x1] %vm1013_vm4, %v2620_v52  ;;  %2703 = vst.msk [vmem:[%s4586_s23 + $0x7e] sm:$0x1] %vm1013_vm4, %v2671_v62  ;;  %v2939_v16 = vrot.slane %v2917_v20, %v4577_v10  ;;  %v2947_v54 = vcombine.high %v2925_v3, %v2925_v3  ;;  %v2867_v13 = vrot.slane %v2853_v34, %v4577_v10 }
 0x42b   : > { %2695 = vst.msk [vmem:[%s4586_s23 + $0x3e] sm:$0x1] %vm1013_vm4, %v2622_v43  ;;  %2975 = vst.msk [vmem:[%s4586_s23 + $0x47] sm:$0x1] %vm1013_vm4, %v2925_v3  ;;  %v2946_v50 = vrot.slane %v2918_v38, %v4577_v10  ;;  %v2948_v53 = vcombine.high %v2932_v47, %v2932_v47  ;;  %v2868_v25 = vcombine.high %v2860_v12, %v2860_v12 }
 0x42c   : > { %2979 = vst.msk [vmem:[%s4586_s23 + $0x67] sm:$0x1] %vm1013_vm4, %v2932_v47  ;;  %v2949_v39 = vcombine.high %v2939_v16, %v2939_v16  ;;  %2976 = vst.msk [vmem:[%s4586_s23 + $0x4f] sm:$0x1] %vm1013_vm4, %v2939_v16  ;;  %v2876_v1 = vrot.slane %v2860_v12, %v4577_v10  ;;  %v2869_v28 = vcombine.high %v2867_v13, %v2867_v13 }
 0x42d   : > { %2977 = vst.msk [vmem:[%s4586_s23 + $0x57] sm:$0x1] %vm1013_vm4, %v2947_v54  ;;  %v2950_v33 = vcombine.high %v2946_v50, %v2946_v50  ;;  %2980 = vst.msk [vmem:[%s4586_s23 + $0x6f] sm:$0x1] %vm1013_vm4, %v2946_v50  ;;  %v2883_v19 = vrot.slane %v2867_v13, %v4577_v10  ;;  %v2890_v2 = vrot.slane %v2868_v25, %v4577_v10 }
 0x42e   : > { %2981 = vst.msk [vmem:[%s4586_s23 + $0x77] sm:$0x1] %vm1013_vm4, %v2948_v53  ;;  %2978 = vst.msk [vmem:[%s4586_s23 + $0x5f] sm:$0x1] %vm1013_vm4, %v2949_v39  ;;  %v2898_v26 = vcombine.high %v2876_v1, %v2876_v1  ;;  %v2897_v30 = vrot.slane %v2869_v28, %v4577_v10 }
 0x42f   : > { %2967 = vst.msk [vmem:[%s4586_s23 + $0x7] sm:$0x1] %vm1013_vm4, %v2876_v1  ;;  %2982 = vst.msk [vmem:[%s4586_s23 + $0x7f] sm:$0x1] %vm1013_vm4, %v2950_v33  ;;  %v2899_v48 = vcombine.high %v2883_v19, %v2883_v19  ;;  %v2900_v44 = vcombine.high %v2890_v2, %v2890_v2 }
 0x430   : > { %2968 = vst.msk [vmem:[%s4586_s23 + $0xf] sm:$0x1] %vm1013_vm4, %v2890_v2  ;;  %2971 = vst.msk [vmem:[%s4586_s23 + $0x27] sm:$0x1] %vm1013_vm4, %v2883_v19  ;;  %v2901_v5 = vcombine.high %v2897_v30, %v2897_v30 }
 0x431   : > { %2969 = vst.msk [vmem:[%s4586_s23 + $0x17] sm:$0x1] %vm1013_vm4, %v2898_v26  ;;  %2970 = vst.msk [vmem:[%s4586_s23 + $0x1f] sm:$0x1] %vm1013_vm4, %v2900_v44 }
 0x432   : > { %2972 = vst.msk [vmem:[%s4586_s23 + $0x2f] sm:$0x1] %vm1013_vm4, %v2897_v30  ;;  %2973 = vst.msk [vmem:[%s4586_s23 + $0x37] sm:$0x1] %vm1013_vm4, %v2899_v48 }
 0x433   : > { %2974 = vst.msk [vmem:[%s4586_s23 + $0x3f] sm:$0x1] %vm1013_vm4, %v2901_v5 }
 0x434 PF: > { %s17_s26 = sadd.s32 1, %s3859_s26   ;;  %s4973_s24 = smov %s3855_s25 }
 0x435   : > { %p14_p5 = scmp.ge.s32.totalorder %s17_s26, 4   ;;  %s4974_s25 = smov %s4976_s27 }
 0x437   :  { %16 = sbr.rel (!%p14_p5) target bundleno = 2 (0x2), region = 85 }

</bundles_post_ra>
